<compile_context>
chip_gen: v6e
topology: v6e:2x2x1
jax: 0.10.0
libtpu: 0.0.40
codegen_flags: <defaults>
</compile_context>

<pallas_src>
import numpy as np
import jax
import jax.numpy as jnp
from jax import lax
from jax.experimental import pallas as pl
from jax.experimental.pallas import tpu as pltpu

K = 3                        # conv kernel size (both convs)
PAD = 2                      # padding (both convs)
GELU_C = 0.7071067811865476  # 1/sqrt(2)


def _make_kernel(Cin, Cmid, Cout, H, W, Wp, base, shifts, LOUT, LM):
    """Fused per-image kernel on the flattened (Hp, Wp) common grid."""
    Krows = K * K * Cmid

    def kernel(x_ref, w1s_ref, b1_ref, w2f_ref, b2_ref, mask_ref, o_ref,
               rg_ref, st_ref):
        # ---- conv1 channel contraction: ONE MXU matmul over all 9 taps ------
        # R[t*Cmid + c, i*W + j] = sum_cin w1[kh,kw,cin,c] * x[cin, i, j]
        R = jnp.dot(w1s_ref[...], x_ref[0],
                    preferred_element_type=jnp.float32)           # (Krows, H*W)

        # ---- re-grid the SMALL result from W-stride rows onto the padded ----
        # (Hp, Wp) common grid (replaces the old wrapper-side HBM pad chain).
        rg_ref[...] = jnp.zeros_like(rg_ref)
        for i in range(H):
            dst = base + i * Wp
            rg_ref[:, dst:dst + W] = R[:, i * W:i * W + W]

        # ---- spatial tap accumulation -> conv1 output on the common grid ----
        acc1 = rg_ref[0:Cmid, shifts[0]:shifts[0] + LM]
        for t in range(1, K * K):
            s = shifts[t]
            acc1 = acc1 + rg_ref[t * Cmid:(t + 1) * Cmid, s:s + LM]

        # ---- bias + exact GELU; zero conv2's padding ring via a lane mask ---
        v1 = acc1 + b1_ref[...]                                    # (Cmid, LM)
        v6 = (v1 * 0.5) * (lax.erf(v1 * GELU_C) + 1.0)
        v6 = v6 * mask_ref[...]

        # ---- conv2: im2col stack + ONE MXU matmul (Cout,18)@(18,LOUT) -------
        for t in range(K * K):
            s = shifts[t]
            st_ref[t * Cmid:(t + 1) * Cmid, :] = v6[:, s:s + LOUT]
        acc2 = jnp.dot(w2f_ref[...], st_ref[...],
                       preferred_element_type=jnp.float32)         # (Cout, LOUT)
        o_ref[0] = (acc2 + b2_ref[...]).astype(o_ref.dtype)        # lane-dense

    return kernel


def _model_forward_impl(x, w1, b1, w2, b2):
    """x: (N, Cin, H, W) NCHW.  w: HWIO.  Returns (N, Cout, H+4, W+4) NCHW."""
    N, Cin, H, W = x.shape
    Cmid = w1.shape[-1]
    Cout = w2.shape[-1]

    # Common grid = conv1 output (H+2, W+2) zero-padded by PAD for conv2.
    Hc1, Wc1 = H + 2 * PAD - (K - 1), W + 2 * PAD - (K - 1)   # conv1 out spatial
    Hp, Wp = Hc1 + 2 * PAD, Wc1 + 2 * PAD                     # common grid
    Hout, Wout = Hc1 + 2 * PAD - (K - 1), Wc1 + 2 * PAD - (K - 1)  # final out

    L = Hp * Wp                              # valid flat grid length (484)
    LOUT = pl.cdiv(L, 128) * 128             # lane-dense output width (512)
    MARGIN = (K - 1) * Wp + (K - 1)          # max flat tap shift (46)
    LM = LOUT + MARGIN                       # v6 / conv1-output flat length
    LRG = pl.cdiv(LM + MARGIN, 128) * 128    # re-grid scratch length
    base = 2 * PAD * Wp + 2 * PAD            # x pixel (0,0) -> grid (4,4), flat
    shifts = [kh * Wp + kw for kh in range(K) for kw in range(K)]
    Krows = K * K * Cmid

    # Free contiguous reshape: flattened spatial axis straight onto lanes.
    x_flat = x.reshape(N, Cin, H * W)

    # conv1 weights stacked over taps: (K*K*Cmid, Cin); conv2 flattened to
    # (Cout, K*K*Cmid).  Row/column ordering is t*Cmid + c for both.
    w1s = jnp.transpose(w1.reshape(K * K, Cin, Cmid), (0, 2, 1)).reshape(Krows, Cin)
    w2f = jnp.transpose(w2.reshape(K * K, Cmid, Cout), (2, 0, 1)).reshape(Cout, Krows)
    b1r = b1.reshape(Cmid, 1)
    b2r = b2.reshape(Cout, 1)

    # Lane mask selecting the valid conv1-output interior of the common grid
    # (everything else is conv2's zero padding).  Pure numpy -> jit constant.
    p = np.arange(LM)
    Y, X = p // Wp, p % Wp
    interior = ((Y >= PAD) & (Y < Hp - PAD) &
                (X >= PAD) & (X < Wp - PAD) & (p < L))
    mask = jnp.asarray(interior.astype(np.float32).reshape(1, LM))

    kernel = _make_kernel(Cin, Cmid, Cout, H, W, Wp, base, shifts, LOUT, LM)

    out_flat = pl.pallas_call(
        kernel,
        out_shape=jax.ShapeDtypeStruct((N, Cout, LOUT), jnp.float32),
        grid_spec=pltpu.PrefetchScalarGridSpec(
            num_scalar_prefetch=0,
            grid=(N,),
            in_specs=[
                pl.BlockSpec((1, Cin, H * W), lambda n: (n, 0, 0)),
                pl.BlockSpec((Krows, Cin), lambda n: (0, 0)),
                pl.BlockSpec((Cmid, 1), lambda n: (0, 0)),
                pl.BlockSpec((Cout, Krows), lambda n: (0, 0)),
                pl.BlockSpec((Cout, 1), lambda n: (0, 0)),
                pl.BlockSpec((1, LM), lambda n: (0, 0)),
            ],
            out_specs=pl.BlockSpec((1, Cout, LOUT), lambda n: (n, 0, 0)),
            scratch_shapes=[
                pltpu.VMEM((Krows, LRG), jnp.float32),   # re-gridded conv1 taps
                pltpu.VMEM((Krows, LOUT), jnp.float32),  # conv2 im2col stack
            ],
        ),
        compiler_params=pltpu.CompilerParams(
            dimension_semantics=("parallel",)),
    )(x_flat, w1s, b1r, w2f, b2r, mask)

    # Single fused slice/reshape crop: drop padded lanes, keep the valid window.
    out = out_flat[:, :, :L].reshape(N, Cout, Hp, Wp)
    return out[:, :, :Hout, :Wout]


model_forward = jax.jit(_model_forward_impl)


def _reference(x_nchw, w1, b1, w2, b2):
    """Pure-JAX reference (lax conv) for the sanity check."""
    xh = jnp.transpose(x_nchw, (0, 2, 3, 1))
    dn = ("NHWC", "HWIO", "NHWC")
    v1 = lax.conv_general_dilated(xh, w1, (1, 1), [(PAD, PAD), (PAD, PAD)],
                                  dimension_numbers=dn) + b1
    v6 = (v1 * 0.5) * (lax.erf(v1 * GELU_C) + 1.0)
    v7 = lax.conv_general_dilated(v6, w2, (1, 1), [(PAD, PAD), (PAD, PAD)],
                                  dimension_numbers=dn) + b2
    return jnp.transpose(v7, (0, 3, 1, 2))


if __name__ == "__main__":
    key = jax.random.PRNGKey(0)
    k_x, k_w1, k_b1, k_w2, k_b2 = jax.random.split(key, 5)

    N, Cin, H, W = 2, 36, 16, 16
    C_mid, C_out = 2, 35

    x = jax.random.normal(k_x, (N, Cin, H, W), dtype=jnp.float32)

    # Deterministic parameter init (PyTorch-style uniform +-1/sqrt(fan_in)).
    fan1 = Cin * K * K
    w1 = jax.random.uniform(k_w1, (K, K, Cin, C_mid), jnp.float32,
                            -1.0 / fan1 ** 0.5, 1.0 / fan1 ** 0.5)
    b1 = jax.random.uniform(k_b1, (C_mid,), jnp.float32,
                            -1.0 / fan1 ** 0.5, 1.0 / fan1 ** 0.5)
    fan2 = C_mid * K * K
    w2 = jax.random.uniform(k_w2, (K, K, C_mid, C_out), jnp.float32,
                            -1.0 / fan2 ** 0.5, 1.0 / fan2 ** 0.5)
    b2 = jax.random.uniform(k_b2, (C_out,), jnp.float32,
                            -1.0 / fan2 ** 0.5, 1.0 / fan2 ** 0.5)

    out = model_forward(x, w1, b1, w2, b2)
    out = jax.block_until_ready(out)

    ref = _reference(x, w1, b1, w2, b2)
    assert out.shape == (N, C_out, H + 4, W + 4), out.shape
    assert jnp.allclose(out, ref, atol=1e-4, rtol=1e-4), \
        float(jnp.max(jnp.abs(out - ref)))

    print("KERNEL_OK")
</pallas_src>

<mosaic_0001>
module attributes {stable_mosaic.version = 11 : i64} {
  func.func @kernel(%arg0: i32, %arg1: memref<1x36x256xf32, #tpu.memory_space<vmem>>, %arg2: memref<18x36xf32, #tpu.memory_space<vmem>>, %arg3: memref<2x1xf32, #tpu.memory_space<vmem>>, %arg4: memref<35x18xf32, #tpu.memory_space<vmem>>, %arg5: memref<35x1xf32, #tpu.memory_space<vmem>>, %arg6: memref<1x558xf32, #tpu.memory_space<vmem>>, %arg7: memref<1x35x512xf32, #tpu.memory_space<vmem>>, %arg8: memref<18x640xf32, #tpu.memory_space<vmem>>, %arg9: memref<18x512xf32, #tpu.memory_space<vmem>>) attributes {dimension_semantics = [#tpu.dimension_semantics<parallel>], iteration_bounds = array<i64: 2>, scalar_prefetch = 0 : i64, scratch_operands = 2 : i64, tpu.core_type = #tpu.core_type<tc>, window_params = [{transform_indices = @transform_0, window_bounds = array<i64: 1, 36, 256>}, {pipeline_mode = #tpu.pipeline_mode<synchronous>, transform_indices = @transform_1, window_bounds = array<i64: 18, 36>}, {pipeline_mode = #tpu.pipeline_mode<synchronous>, transform_indices = @transform_2, window_bounds = array<i64: 2, 1>}, {pipeline_mode = #tpu.pipeline_mode<synchronous>, transform_indices = @transform_3, window_bounds = array<i64: 35, 18>}, {pipeline_mode = #tpu.pipeline_mode<synchronous>, transform_indices = @transform_4, window_bounds = array<i64: 35, 1>}, {pipeline_mode = #tpu.pipeline_mode<synchronous>, transform_indices = @transform_5, window_bounds = array<i64: 1, 558>}, {transform_indices = @transform_6, window_bounds = array<i64: 1, 35, 512>}]} {
    %c0 = arith.constant 0 : index
    %c0_0 = arith.constant 0 : index
    %0 = vector.load %arg2[%c0, %c0_0] : memref<18x36xf32, #tpu.memory_space<vmem>>, vector<18x36xf32>
    %c0_1 = arith.constant 0 : index
    %c0_2 = arith.constant 0 : index
    %c0_3 = arith.constant 0 : index
    %1 = vector.load %arg1[%c0_1, %c0_2, %c0_3] : memref<1x36x256xf32, #tpu.memory_space<vmem>>, vector<1x36x256xf32>
    %2 = vector.shape_cast %1 : vector<1x36x256xf32> to vector<36x256xf32>
    %cst = arith.constant dense<0.000000e+00> : vector<18x256xf32>
    %3 = tpu.matmul %0, %2, %cst {dimension_numbers = #tpu.dot_dimension_numbers<[1], [0], [0], [1], [0, 0, 1, 1], [], []>} : vector<18x36xf32>, vector<36x256xf32>, vector<18x256xf32> -> vector<18x256xf32>
    %cst_4 = arith.constant 0.000000e+00 : f32
    %4 = vector.broadcast %cst_4 : f32 to vector<18x640xf32>
    %c0_5 = arith.constant 0 : index
    %c0_6 = arith.constant 0 : index
    %5 = vector.load %arg8[%c0_5, %c0_6] : memref<18x640xf32, #tpu.memory_space<vmem>>, vector<18x640xf32>
    tpu.vector_store %arg8[%c0_5, %c0_6], %4 {strides = array<i32>} : memref<18x640xf32, #tpu.memory_space<vmem>>, vector<18x640xf32>,
    %6 = vector.extract_strided_slice %3 {offsets = [0, 0], sizes = [18, 16], strides = [1, 1]} : vector<18x256xf32> to vector<18x16xf32>
    %c0_7 = arith.constant 0 : index
    %c92 = arith.constant 92 : index
    %7 = vector.load %arg8[%c0_7, %c92] : memref<18x640xf32, #tpu.memory_space<vmem>>, vector<18x16xf32>
    tpu.vector_store %arg8[%c0_7, %c92], %6 {strides = array<i32>} : memref<18x640xf32, #tpu.memory_space<vmem>>, vector<18x16xf32>,
    %8 = vector.extract_strided_slice %3 {offsets = [0, 16], sizes = [18, 16], strides = [1, 1]} : vector<18x256xf32> to vector<18x16xf32>
    %c0_8 = arith.constant 0 : index
    %c114 = arith.constant 114 : index
    %9 = vector.load %arg8[%c0_8, %c114] : memref<18x640xf32, #tpu.memory_space<vmem>>, vector<18x16xf32>
    tpu.vector_store %arg8[%c0_8, %c114], %8 {strides = array<i32>} : memref<18x640xf32, #tpu.memory_space<vmem>>, vector<18x16xf32>,
    %10 = vector.extract_strided_slice %3 {offsets = [0, 32], sizes = [18, 16], strides = [1, 1]} : vector<18x256xf32> to vector<18x16xf32>
    %c0_9 = arith.constant 0 : index
    %c136 = arith.constant 136 : index
    %11 = vector.load %arg8[%c0_9, %c136] : memref<18x640xf32, #tpu.memory_space<vmem>>, vector<18x16xf32>
    tpu.vector_store %arg8[%c0_9, %c136], %10 {strides = array<i32>} : memref<18x640xf32, #tpu.memory_space<vmem>>, vector<18x16xf32>,
    %12 = vector.extract_strided_slice %3 {offsets = [0, 48], sizes = [18, 16], strides = [1, 1]} : vector<18x256xf32> to vector<18x16xf32>
    %c0_10 = arith.constant 0 : index
    %c158 = arith.constant 158 : index
    %13 = vector.load %arg8[%c0_10, %c158] : memref<18x640xf32, #tpu.memory_space<vmem>>, vector<18x16xf32>
    tpu.vector_store %arg8[%c0_10, %c158], %12 {strides = array<i32>} : memref<18x640xf32, #tpu.memory_space<vmem>>, vector<18x16xf32>,
    %14 = vector.extract_strided_slice %3 {offsets = [0, 64], sizes = [18, 16], strides = [1, 1]} : vector<18x256xf32> to vector<18x16xf32>
    %c0_11 = arith.constant 0 : index
    %c180 = arith.constant 180 : index
    %15 = vector.load %arg8[%c0_11, %c180] : memref<18x640xf32, #tpu.memory_space<vmem>>, vector<18x16xf32>
    tpu.vector_store %arg8[%c0_11, %c180], %14 {strides = array<i32>} : memref<18x640xf32, #tpu.memory_space<vmem>>, vector<18x16xf32>,
    %16 = vector.extract_strided_slice %3 {offsets = [0, 80], sizes = [18, 16], strides = [1, 1]} : vector<18x256xf32> to vector<18x16xf32>
    %c0_12 = arith.constant 0 : index
    %c202 = arith.constant 202 : index
    %17 = vector.load %arg8[%c0_12, %c202] : memref<18x640xf32, #tpu.memory_space<vmem>>, vector<18x16xf32>
    tpu.vector_store %arg8[%c0_12, %c202], %16 {strides = array<i32>} : memref<18x640xf32, #tpu.memory_space<vmem>>, vector<18x16xf32>,
    %18 = vector.extract_strided_slice %3 {offsets = [0, 96], sizes = [18, 16], strides = [1, 1]} : vector<18x256xf32> to vector<18x16xf32>
    %c0_13 = arith.constant 0 : index
    %c224 = arith.constant 224 : index
    %19 = vector.load %arg8[%c0_13, %c224] : memref<18x640xf32, #tpu.memory_space<vmem>>, vector<18x16xf32>
    tpu.vector_store %arg8[%c0_13, %c224], %18 {strides = array<i32>} : memref<18x640xf32, #tpu.memory_space<vmem>>, vector<18x16xf32>,
    %20 = vector.extract_strided_slice %3 {offsets = [0, 112], sizes = [18, 16], strides = [1, 1]} : vector<18x256xf32> to vector<18x16xf32>
    %c0_14 = arith.constant 0 : index
    %c246 = arith.constant 246 : index
    %21 = vector.load %arg8[%c0_14, %c246] : memref<18x640xf32, #tpu.memory_space<vmem>>, vector<18x16xf32>
    tpu.vector_store %arg8[%c0_14, %c246], %20 {strides = array<i32>} : memref<18x640xf32, #tpu.memory_space<vmem>>, vector<18x16xf32>,
    %22 = vector.extract_strided_slice %3 {offsets = [0, 128], sizes = [18, 16], strides = [1, 1]} : vector<18x256xf32> to vector<18x16xf32>
    %c0_15 = arith.constant 0 : index
    %c268 = arith.constant 268 : index
    %23 = vector.load %arg8[%c0_15, %c268] : memref<18x640xf32, #tpu.memory_space<vmem>>, vector<18x16xf32>
    tpu.vector_store %arg8[%c0_15, %c268], %22 {strides = array<i32>} : memref<18x640xf32, #tpu.memory_space<vmem>>, vector<18x16xf32>,
    %24 = vector.extract_strided_slice %3 {offsets = [0, 144], sizes = [18, 16], strides = [1, 1]} : vector<18x256xf32> to vector<18x16xf32>
    %c0_16 = arith.constant 0 : index
    %c290 = arith.constant 290 : index
    %25 = vector.load %arg8[%c0_16, %c290] : memref<18x640xf32, #tpu.memory_space<vmem>>, vector<18x16xf32>
    tpu.vector_store %arg8[%c0_16, %c290], %24 {strides = array<i32>} : memref<18x640xf32, #tpu.memory_space<vmem>>, vector<18x16xf32>,
    %26 = vector.extract_strided_slice %3 {offsets = [0, 160], sizes = [18, 16], strides = [1, 1]} : vector<18x256xf32> to vector<18x16xf32>
    %c0_17 = arith.constant 0 : index
    %c312 = arith.constant 312 : index
    %27 = vector.load %arg8[%c0_17, %c312] : memref<18x640xf32, #tpu.memory_space<vmem>>, vector<18x16xf32>
    tpu.vector_store %arg8[%c0_17, %c312], %26 {strides = array<i32>} : memref<18x640xf32, #tpu.memory_space<vmem>>, vector<18x16xf32>,
    %28 = vector.extract_strided_slice %3 {offsets = [0, 176], sizes = [18, 16], strides = [1, 1]} : vector<18x256xf32> to vector<18x16xf32>
    %c0_18 = arith.constant 0 : index
    %c334 = arith.constant 334 : index
    %29 = vector.load %arg8[%c0_18, %c334] : memref<18x640xf32, #tpu.memory_space<vmem>>, vector<18x16xf32>
    tpu.vector_store %arg8[%c0_18, %c334], %28 {strides = array<i32>} : memref<18x640xf32, #tpu.memory_space<vmem>>, vector<18x16xf32>,
    %30 = vector.extract_strided_slice %3 {offsets = [0, 192], sizes = [18, 16], strides = [1, 1]} : vector<18x256xf32> to vector<18x16xf32>
    %c0_19 = arith.constant 0 : index
    %c356 = arith.constant 356 : index
    %31 = vector.load %arg8[%c0_19, %c356] : memref<18x640xf32, #tpu.memory_space<vmem>>, vector<18x16xf32>
    tpu.vector_store %arg8[%c0_19, %c356], %30 {strides = array<i32>} : memref<18x640xf32, #tpu.memory_space<vmem>>, vector<18x16xf32>,
    %32 = vector.extract_strided_slice %3 {offsets = [0, 208], sizes = [18, 16], strides = [1, 1]} : vector<18x256xf32> to vector<18x16xf32>
    %c0_20 = arith.constant 0 : index
    %c378 = arith.constant 378 : index
    %33 = vector.load %arg8[%c0_20, %c378] : memref<18x640xf32, #tpu.memory_space<vmem>>, vector<18x16xf32>
    tpu.vector_store %arg8[%c0_20, %c378], %32 {strides = array<i32>} : memref<18x640xf32, #tpu.memory_space<vmem>>, vector<18x16xf32>,
    %34 = vector.extract_strided_slice %3 {offsets = [0, 224], sizes = [18, 16], strides = [1, 1]} : vector<18x256xf32> to vector<18x16xf32>
    %c0_21 = arith.constant 0 : index
    %c400 = arith.constant 400 : index
    %35 = vector.load %arg8[%c0_21, %c400] : memref<18x640xf32, #tpu.memory_space<vmem>>, vector<18x16xf32>
    tpu.vector_store %arg8[%c0_21, %c400], %34 {strides = array<i32>} : memref<18x640xf32, #tpu.memory_space<vmem>>, vector<18x16xf32>,
    %36 = vector.extract_strided_slice %3 {offsets = [0, 240], sizes = [18, 16], strides = [1, 1]} : vector<18x256xf32> to vector<18x16xf32>
    %c0_22 = arith.constant 0 : index
    %c422 = arith.constant 422 : index
    %37 = vector.load %arg8[%c0_22, %c422] : memref<18x640xf32, #tpu.memory_space<vmem>>, vector<18x16xf32>
    tpu.vector_store %arg8[%c0_22, %c422], %36 {strides = array<i32>} : memref<18x640xf32, #tpu.memory_space<vmem>>, vector<18x16xf32>,
    %c0_23 = arith.constant 0 : index
    %c0_24 = arith.constant 0 : index
    %38 = vector.load %arg8[%c0_23, %c0_24] : memref<18x640xf32, #tpu.memory_space<vmem>>, vector<2x558xf32>
    %c2 = arith.constant 2 : index
    %c1 = arith.constant 1 : index
    %39 = vector.load %arg8[%c2, %c1] : memref<18x640xf32, #tpu.memory_space<vmem>>, vector<2x558xf32>
    %40 = arith.addf %38, %39 : vector<2x558xf32>
    %c4 = arith.constant 4 : index
    %c2_25 = arith.constant 2 : index
    %41 = vector.load %arg8[%c4, %c2_25] : memref<18x640xf32, #tpu.memory_space<vmem>>, vector<2x558xf32>
    %42 = arith.addf %40, %41 : vector<2x558xf32>
    %c6 = arith.constant 6 : index
    %c22 = arith.constant 22 : index
    %43 = vector.load %arg8[%c6, %c22] : memref<18x640xf32, #tpu.memory_space<vmem>>, vector<2x558xf32>
    %44 = arith.addf %42, %43 : vector<2x558xf32>
    %c8 = arith.constant 8 : index
    %c23 = arith.constant 23 : index
    %45 = vector.load %arg8[%c8, %c23] : memref<18x640xf32, #tpu.memory_space<vmem>>, vector<2x558xf32>
    %46 = arith.addf %44, %45 : vector<2x558xf32>
    %c10 = arith.constant 10 : index
    %c24 = arith.constant 24 : index
    %47 = vector.load %arg8[%c10, %c24] : memref<18x640xf32, #tpu.memory_space<vmem>>, vector<2x558xf32>
    %48 = arith.addf %46, %47 : vector<2x558xf32>
    %c12 = arith.constant 12 : index
    %c44 = arith.constant 44 : index
    %49 = vector.load %arg8[%c12, %c44] : memref<18x640xf32, #tpu.memory_space<vmem>>, vector<2x558xf32>
    %50 = arith.addf %48, %49 : vector<2x558xf32>
    %c14 = arith.constant 14 : index
    %c45 = arith.constant 45 : index
    %51 = vector.load %arg8[%c14, %c45] : memref<18x640xf32, #tpu.memory_space<vmem>>, vector<2x558xf32>
    %52 = arith.addf %50, %51 : vector<2x558xf32>
    %c16 = arith.constant 16 : index
    %c46 = arith.constant 46 : index
    %53 = vector.load %arg8[%c16, %c46] : memref<18x640xf32, #tpu.memory_space<vmem>>, vector<2x558xf32>
    %54 = arith.addf %52, %53 : vector<2x558xf32>
    %c0_26 = arith.constant 0 : index
    %c0_27 = arith.constant 0 : index
    %55 = vector.load %arg3[%c0_26, %c0_27] : memref<2x1xf32, #tpu.memory_space<vmem>>, vector<2x1xf32>
    %56 = vector.broadcast %55 : vector<2x1xf32> to vector<2x558xf32>
    %57 = arith.addf %54, %56 : vector<2x558xf32>
    %cst_28 = arith.constant 5.000000e-01 : f32
    %58 = vector.broadcast %cst_28 : f32 to vector<2x558xf32>
    %59 = arith.mulf %57, %58 : vector<2x558xf32>
    %cst_29 = arith.constant 0.707106769 : f32
    %60 = vector.broadcast %cst_29 : f32 to vector<2x558xf32>
    %61 = arith.mulf %57, %60 : vector<2x558xf32>
    %62 = math.erf %61 : vector<2x558xf32>
    %cst_30 = arith.constant 1.000000e+00 : f32
    %63 = vector.broadcast %cst_30 : f32 to vector<2x558xf32>
    %64 = arith.addf %62, %63 : vector<2x558xf32>
    %65 = arith.mulf %59, %64 : vector<2x558xf32>
    %c0_31 = arith.constant 0 : index
    %c0_32 = arith.constant 0 : index
    %66 = vector.load %arg6[%c0_31, %c0_32] : memref<1x558xf32, #tpu.memory_space<vmem>>, vector<1x558xf32>
    %67 = vector.broadcast %66 : vector<1x558xf32> to vector<2x558xf32>
    %68 = arith.mulf %65, %67 : vector<2x558xf32>
    %69 = vector.extract_strided_slice %68 {offsets = [0, 0], sizes = [2, 512], strides = [1, 1]} : vector<2x558xf32> to vector<2x512xf32>
    %c0_33 = arith.constant 0 : index
    %c0_34 = arith.constant 0 : index
    %70 = vector.load %arg9[%c0_33, %c0_34] : memref<18x512xf32, #tpu.memory_space<vmem>>, vector<2x512xf32>
    tpu.vector_store %arg9[%c0_33, %c0_34], %69 {strides = array<i32>} : memref<18x512xf32, #tpu.memory_space<vmem>>, vector<2x512xf32>,
    %71 = vector.extract_strided_slice %68 {offsets = [0, 1], sizes = [2, 512], strides = [1, 1]} : vector<2x558xf32> to vector<2x512xf32>
    %c2_35 = arith.constant 2 : index
    %c0_36 = arith.constant 0 : index
    %72 = vector.load %arg9[%c2_35, %c0_36] : memref<18x512xf32, #tpu.memory_space<vmem>>, vector<2x512xf32>
    tpu.vector_store %arg9[%c2_35, %c0_36], %71 {strides = array<i32>} : memref<18x512xf32, #tpu.memory_space<vmem>>, vector<2x512xf32>,
    %73 = vector.extract_strided_slice %68 {offsets = [0, 2], sizes = [2, 512], strides = [1, 1]} : vector<2x558xf32> to vector<2x512xf32>
    %c4_37 = arith.constant 4 : index
    %c0_38 = arith.constant 0 : index
    %74 = vector.load %arg9[%c4_37, %c0_38] : memref<18x512xf32, #tpu.memory_space<vmem>>, vector<2x512xf32>
    tpu.vector_store %arg9[%c4_37, %c0_38], %73 {strides = array<i32>} : memref<18x512xf32, #tpu.memory_space<vmem>>, vector<2x512xf32>,
    %75 = vector.extract_strided_slice %68 {offsets = [0, 22], sizes = [2, 512], strides = [1, 1]} : vector<2x558xf32> to vector<2x512xf32>
    %c6_39 = arith.constant 6 : index
    %c0_40 = arith.constant 0 : index
    %76 = vector.load %arg9[%c6_39, %c0_40] : memref<18x512xf32, #tpu.memory_space<vmem>>, vector<2x512xf32>
    tpu.vector_store %arg9[%c6_39, %c0_40], %75 {strides = array<i32>} : memref<18x512xf32, #tpu.memory_space<vmem>>, vector<2x512xf32>,
    %77 = vector.extract_strided_slice %68 {offsets = [0, 23], sizes = [2, 512], strides = [1, 1]} : vector<2x558xf32> to vector<2x512xf32>
    %c8_41 = arith.constant 8 : index
    %c0_42 = arith.constant 0 : index
    %78 = vector.load %arg9[%c8_41, %c0_42] : memref<18x512xf32, #tpu.memory_space<vmem>>, vector<2x512xf32>
    tpu.vector_store %arg9[%c8_41, %c0_42], %77 {strides = array<i32>} : memref<18x512xf32, #tpu.memory_space<vmem>>, vector<2x512xf32>,
    %79 = vector.extract_strided_slice %68 {offsets = [0, 24], sizes = [2, 512], strides = [1, 1]} : vector<2x558xf32> to vector<2x512xf32>
    %c10_43 = arith.constant 10 : index
    %c0_44 = arith.constant 0 : index
    %80 = vector.load %arg9[%c10_43, %c0_44] : memref<18x512xf32, #tpu.memory_space<vmem>>, vector<2x512xf32>
    tpu.vector_store %arg9[%c10_43, %c0_44], %79 {strides = array<i32>} : memref<18x512xf32, #tpu.memory_space<vmem>>, vector<2x512xf32>,
    %81 = vector.extract_strided_slice %68 {offsets = [0, 44], sizes = [2, 512], strides = [1, 1]} : vector<2x558xf32> to vector<2x512xf32>
    %c12_45 = arith.constant 12 : index
    %c0_46 = arith.constant 0 : index
    %82 = vector.load %arg9[%c12_45, %c0_46] : memref<18x512xf32, #tpu.memory_space<vmem>>, vector<2x512xf32>
    tpu.vector_store %arg9[%c12_45, %c0_46], %81 {strides = array<i32>} : memref<18x512xf32, #tpu.memory_space<vmem>>, vector<2x512xf32>,
    %83 = vector.extract_strided_slice %68 {offsets = [0, 45], sizes = [2, 512], strides = [1, 1]} : vector<2x558xf32> to vector<2x512xf32>
    %c14_47 = arith.constant 14 : index
    %c0_48 = arith.constant 0 : index
    %84 = vector.load %arg9[%c14_47, %c0_48] : memref<18x512xf32, #tpu.memory_space<vmem>>, vector<2x512xf32>
    tpu.vector_store %arg9[%c14_47, %c0_48], %83 {strides = array<i32>} : memref<18x512xf32, #tpu.memory_space<vmem>>, vector<2x512xf32>,
    %85 = vector.extract_strided_slice %68 {offsets = [0, 46], sizes = [2, 512], strides = [1, 1]} : vector<2x558xf32> to vector<2x512xf32>
    %c16_49 = arith.constant 16 : index
    %c0_50 = arith.constant 0 : index
    %86 = vector.load %arg9[%c16_49, %c0_50] : memref<18x512xf32, #tpu.memory_space<vmem>>, vector<2x512xf32>
    tpu.vector_store %arg9[%c16_49, %c0_50], %85 {strides = array<i32>} : memref<18x512xf32, #tpu.memory_space<vmem>>, vector<2x512xf32>,
    %c0_51 = arith.constant 0 : index
    %c0_52 = arith.constant 0 : index
    %87 = vector.load %arg4[%c0_51, %c0_52] : memref<35x18xf32, #tpu.memory_space<vmem>>, vector<35x18xf32>
    %c0_53 = arith.constant 0 : index
    %c0_54 = arith.constant 0 : index
    %88 = vector.load %arg9[%c0_53, %c0_54] : memref<18x512xf32, #tpu.memory_space<vmem>>, vector<18x512xf32>
    %cst_55 = arith.constant dense<0.000000e+00> : vector<35x512xf32>
    %89 = tpu.matmul %87, %88, %cst_55 {dimension_numbers = #tpu.dot_dimension_numbers<[1], [0], [0], [1], [0, 0, 1, 1], [], []>} : vector<35x18xf32>, vector<18x512xf32>, vector<35x512xf32> -> vector<35x512xf32>
    %c0_56 = arith.constant 0 : index
    %c0_57 = arith.constant 0 : index
    %90 = vector.load %arg5[%c0_56, %c0_57] : memref<35x1xf32, #tpu.memory_space<vmem>>, vector<35x1xf32>
    %91 = vector.broadcast %90 : vector<35x1xf32> to vector<35x512xf32>
    %92 = arith.addf %89, %91 : vector<35x512xf32>
    %c0_58 = arith.constant 0 : index
    %c0_59 = arith.constant 0 : index
    %c0_60 = arith.constant 0 : index
    %93 = vector.load %arg7[%c0_58, %c0_59, %c0_60] : memref<1x35x512xf32, #tpu.memory_space<vmem>>, vector<1x35x512xf32>
    %94 = vector.shape_cast %93 : vector<1x35x512xf32> to vector<35x512xf32>
    %95 = vector.shape_cast %92 : vector<35x512xf32> to vector<1x35x512xf32>
    tpu.vector_store %arg7[%c0_58, %c0_59, %c0_60], %95 {strides = array<i32>} : memref<1x35x512xf32, #tpu.memory_space<vmem>>, vector<1x35x512xf32>,
    return
  }
  func.func @transform_0(%arg0: i32) -> (i32, i32, i32) {
    %c0_i32 = arith.constant 0 : i32
    %c0_i32_0 = arith.constant 0 : i32
    %c0_i32_1 = arith.constant 0 : i32
    return %arg0, %c0_i32, %c0_i32_0 : i32, i32, i32
  }
  func.func @transform_1(%arg0: i32) -> (i32, i32) {
    %c0_i32 = arith.constant 0 : i32
    %c0_i32_0 = arith.constant 0 : i32
    %c0_i32_1 = arith.constant 0 : i32
    return %c0_i32, %c0_i32_0 : i32, i32
  }
  func.func @transform_2(%arg0: i32) -> (i32, i32) {
    %c0_i32 = arith.constant 0 : i32
    %c0_i32_0 = arith.constant 0 : i32
    %c0_i32_1 = arith.constant 0 : i32
    return %c0_i32, %c0_i32_0 : i32, i32
  }
  func.func @transform_3(%arg0: i32) -> (i32, i32) {
    %c0_i32 = arith.constant 0 : i32
    %c0_i32_0 = arith.constant 0 : i32
    %c0_i32_1 = arith.constant 0 : i32
    return %c0_i32, %c0_i32_0 : i32, i32
  }
  func.func @transform_4(%arg0: i32) -> (i32, i32) {
    %c0_i32 = arith.constant 0 : i32
    %c0_i32_0 = arith.constant 0 : i32
    %c0_i32_1 = arith.constant 0 : i32
    return %c0_i32, %c0_i32_0 : i32, i32
  }
  func.func @transform_5(%arg0: i32) -> (i32, i32) {
    %c0_i32 = arith.constant 0 : i32
    %c0_i32_0 = arith.constant 0 : i32
    %c0_i32_1 = arith.constant 0 : i32
    return %c0_i32, %c0_i32_0 : i32, i32
  }
  func.func @transform_6(%arg0: i32) -> (i32, i32, i32) {
    %c0_i32 = arith.constant 0 : i32
    %c0_i32_0 = arith.constant 0 : i32
    %c0_i32_1 = arith.constant 0 : i32
    return %arg0, %c0_i32, %c0_i32_0 : i32, i32, i32
  }
}

</mosaic_0001>

<bundles_post_ra>
// kernel: _model_forward_impl.1
= control target key start
LH: loop header
LB: loop body
LE: loop exit
PB: predicated region body
PF: predicated region fallthrough
CT: control target
= control target key end

     0   :  { %s1688_s21 = smov 0   ;;  %s2119_s0 = inlined_call_operand.vmem [shape: f32[2,36,256], index: 0, kind: input, shape index: {}]   ;;  %s2120_s1 = inlined_call_operand.vmem [shape: f32[18,36], index: 1, kind: input, shape index: {}]   ;;  %s2121_s2 = inlined_call_operand.vmem [shape: f32[2,1], index: 2, kind: input, shape index: {}]   ;;  %s2122_s3 = inlined_call_operand.vmem [shape: f32[35,18], index: 3, kind: input, shape index: {}]   ;;  %s2123_s4 = inlined_call_operand.vmem [shape: f32[35,1], index: 4, kind: input, shape index: {}]   ;;  %s2124_s5 = inlined_call_operand.vmem [shape: f32[1,558], index: 5, kind: input, shape index: {}]   ;;  %s2125_s6 = inlined_call_operand.vmem [shape: f32[2,35,512], index: 6, kind: output, shape index: {}]  }
   0x1 LB: > { %s1540_s22 = sadd.s32 4294967295, %s1627_s21   ;;  %p1544_p0 = scmp.ge.s32.totalorder %s1627_s21, 1  ;;  %s1627_s21 = sphi %s1688_s21, %s16_s21  }
   0x2   : > { %p212_p1 = scmp.lt.s32.totalorder %s1627_s21, 3 }
   0x4   : > { %p213_p2 = pnand %p1544_p0, %p212_p1 }
   0x5   : > { %p1696_p3 = scmp.lt.s32.totalorder (!%p213_p2), %s1540_s22, 1  ;;  %s1631_s10 = smov (!%p213_p2), 104  }
   0x6   : > { %216 = sbr.rel (%p213_p2) target bundleno = 1004 (0x3ec), region = 44  ;;  %s1632_s11 = smov (!%p213_p2), 98  }
   0x7   : > { %s1633_s12 = smov (!%p213_p2), 92   ;;  %s1634_s13 = smov (!%p213_p2), 6  }
   0x8   : > { %s1635_s14 = smov (!%p213_p2), 110   ;;  %s1636_s15 = smov (!%p213_p2), 12  }
   0x9   : > { %s1637_s16 = smov (!%p213_p2), 116   ;;  %s1638_s17 = smov (!%p213_p2), 18  }
   0xa   : > { %s1639_s18 = smov (!%p213_p2), 122   ;;  %s1640_s19 = smov (!%p213_p2), 24  }
   0xb   : > { %v1629_v0 = vmov 0.0   ;;  %s2134_s22 = smov (!%p1696_p3, %s1540_s22), 1  ;;  %vm275_vm0 = vcmask 1043456   ;;  %v252_v11 = vld [vmem:[%s2120_s1] sm:$0xff]  ;;  %vm265_vm1 = vcmask 293888   ;;  %v253_v12 = vld [vmem:[%s2120_s1 + $0x8] sm:$0xff] }
   0xc   : > { %346 = vmatprep.mubr.f32.mxu0 %v1629_v0  ;;  %365 = vst [vmem:[#allocation2] sm:$0xff] %v1629_v0  ;;  %366 = vst [vmem:[#allocation2 + $0x8] sm:$0xff] %v1629_v0  ;;  %1339 = vmatprep.mubr.f32.mxu1 %v1629_v0  ;;  %s1574_s24 = smul.u32 80, %s2134_s22  ;;  %v254_v13 = vld [vmem:[%s2120_s1 + $0x10] sm:$0x3]  ;;  %v1630_v14 = vmov 0  }
   0xd   : > { %367 = vst [vmem:[#allocation2 + $0x10] sm:$0xff] %v1629_v0  ;;  %368 = vst [vmem:[#allocation2 + $0x18] sm:$0xff] %v1629_v0  ;;  %1608 = vset.pattern.permute.xlu0 %v1630_v14  ;;  %1609 = vset.pattern.permute.xlu1 %v1630_v14  ;;  %s1641_s20 = smov 42   ;;  %s1642_s23 = smov 30   ;;  %v931_v21 = vld [vmem:[%s2121_s2] sm:$0x3] }
   0xe   : > { %369 = vst [vmem:[#allocation2 + $0x20] sm:$0xff] %v1629_v0  ;;  %370 = vst [vmem:[#allocation2 + $0x28] sm:$0xff] %v1629_v0  ;;  %s246_s27 = scalar_lea.vmem %s2119_s0, %s1574_s24  ;;  %s1643_s24 = smov 48   ;;  %vm408_vm2 = vcmask 15360   ;;  %vm425_vm3 = vcmask 195648   ;;  %vm392_vm4 = vcmask 884448  }
   0xf   : > { %371 = vst [vmem:[#allocation2 + $0x30] sm:$0xff] %v1629_v0  ;;  %372 = vst [vmem:[#allocation2 + $0x38] sm:$0xff] %v1629_v0  ;;  %v264_v1 = vld [vmem:[%s246_s27 + $0x48] sm:$0xf]  ;;  %v263_v2 = vld [vmem:[%s246_s27 + $0x40] sm:$0xf] }
  0x10   : > { %373 = vst [vmem:[#allocation2 + $0x40] sm:$0xff] %v1629_v0  ;;  %374 = vst [vmem:[#allocation2 + $0x48] sm:$0xff] %v1629_v0  ;;  %v262_v3 = vld [vmem:[%s246_s27 + $0x38] sm:$0xff]  ;;  %1547 = vmatprep.subr.msk.mxu0 %vm275_vm0, %v264_v1  ;;  %v261_v4 = vld [vmem:[%s246_s27 + $0x30] sm:$0xff]  ;;  %s1644_s25 = smov 36   ;;  %s1645_s26 = smov 54  }
  0x11   : > { %375 = vst [vmem:[#allocation2 + $0x50] sm:$0x3] %v1629_v0  ;;  %376 = vst [vmem:[#allocation2 + $0x58] sm:$0x3] %v1629_v0  ;;  %1548 = vmatpush1.msk.msra.mxu0 %vm275_vm0, %v263_v2  ;;  %v260_v5 = vld [vmem:[%s246_s27 + $0x28] sm:$0xff]  ;;  %v259_v6 = vld [vmem:[%s246_s27 + $0x20] sm:$0xff] }
  0x12   : > { %377 = vst [vmem:[#allocation2 + $0x60] sm:$0x3] %v1629_v0  ;;  %378 = vst [vmem:[#allocation2 + $0x68] sm:$0x3] %v1629_v0  ;;  %306 = vmatprep.subr.mxu0 %v262_v3  ;;  %v258_v7 = vld [vmem:[%s246_s27 + $0x18] sm:$0xff]  ;;  %v257_v8 = vld [vmem:[%s246_s27 + $0x10] sm:$0xff] }
  0x13   : > { %379 = vst [vmem:[#allocation2 + $0x70] sm:$0x3] %v1629_v0  ;;  %307 = vmatpush1.msra.mxu0 %v261_v4  ;;  %v256_v9 = vld [vmem:[%s246_s27 + $0x8] sm:$0xff]  ;;  %v255_v10 = vld [vmem:[%s246_s27] sm:$0xff]  ;;  %vm488_vm5 = vcmask 48128   ;;  %vm406_vm6 = vcmask 1048464  }
  0x14   : > { %308 = vmatprep.subr.mxu0 %v260_v5  ;;  %vm439_vm7 = vcmask 376048   ;;  %vm508_vm8 = vcmask 228448   ;;  %vm453_vm9 = vcmask 556448   ;;  %vm2127_vm10 = vcmask 408848   ;;  %s1646_s29 = smov 127   ;;  %s1647_s30 = smov 126  }
  0x15   : > { %309 = vmatpush1.msra.mxu0 %v259_v6  ;;  %vm467_vm11 = vcmask 736848   ;;  %vm2126_vm12 = vcmask 589248   ;;  %vm472_vm13 = vcmask 917248   ;;  %vm2128_vm14 = vcmask 1048496   ;;  %s1648_s7 = smov 106   ;;  %s1649_s8 = smov 105  }
  0x16   : > { %310 = vmatprep.subr.mxu0 %v258_v7  ;;  %vm580_vm15 = vcmask 80896   ;;  %vm550_vm0 = vcmask 769648   ;;  %s1650_s9 = smov 83  }
  0x17   : > { %311 = vmatpush1.msra.mxu0 %v257_v8 }
  0x18   : > { %312 = vmatprep.subr.mxu0 %v256_v9 }
  0x19   : > { %313 = vmatpush1.msra.mxu0 %v255_v10 }
  0x1a   : > { %1549 = vmatmul.mubr.msk.f32.vlgmr.msra.gmra.mxu0 %vm265_vm1, %v252_v11 }
  0x1b   : > { %352 = vmatprep.mubr.f32.mxu0 %v1629_v0 }
  0x1e   : > { %1550 = vmatmul.mubr.msk.f32.gmra.mxu0 %vm265_vm1, %v253_v12 }
  0x1f   : > { %358 = vmatprep.mubr.f32.mxu0 %v1629_v0 }
  0x22   : > { %1551 = vmatmul.mubr.msk.f32.gmra.mxu0 %vm265_vm1, %v254_v13  ;;  %vm597_vm1 = vcmask 261248  }
  0x23   : > { %1434 = vmatprep.mubr.f32.mxu0 %v1629_v0 }
  0xda   : > { %v1717_v15 = vpop.f32.mrf.mxu0 }
  0xdb   : > { %416 = vrot.lane.b32.xlu1 %v1717_v15, %s1631_s10  ;;  %397 = vrot.lane.b32.xlu0 %v1717_v15, %s1632_s11 }
  0xdc   : > { %v350_v16 = vpop.f32.mrf.mxu0 }
  0xde   : > { %v1740_v17 = vpop.f32.mrf.mxu0 }
  0xdf   : > { %383 = vrot.lane.b32.xlu1 %v1717_v15, %s1633_s12  ;;  %477 = vrot.lane.b32.xlu0 %v1717_v15, %s1634_s13 }
  0xe0   : > { %v356_v18 = vpop.f32.mrf.mxu0 }
  0xe2   : > { %v1765_v19 = vpop.f32.mrf.mxu0 }
  0xe3   : > { %430 = vrot.lane.b32.xlu0 %v1717_v15, %s1635_s14  ;;  %499 = vrot.lane.b32.xlu1 %v350_v16, %s1636_s15 }
  0xe4   : > { %v362_v20 = vpop.f32.mrf.mxu0 }
  0xe7   : > { %444 = vrot.lane.b32.xlu0 %v1717_v15, %s1637_s16  ;;  %513 = vrot.lane.b32.xlu1 %v350_v16, %s1638_s17 }
  0xeb   : > { %458 = vrot.lane.b32.xlu0 %v1717_v15, %s1639_s18  ;;  %527 = vrot.lane.b32.xlu1 %v350_v16, %s1640_s19 }
  0xef   : > { %569 = vrot.lane.b32.xlu0 %v350_v16, %s1641_s20  ;;  %541 = vrot.lane.b32.xlu1 %v350_v16, %s1642_s23 }
  0xf3   : > { %588 = vrot.lane.b32.xlu0 %v350_v16, %s1643_s24  ;;  %555 = vrot.lane.b32.xlu1 %v350_v16, %s1644_s25 }
  0xf7   : > { %602 = vrot.lane.b32.xlu0 %v350_v16, %s1645_s26  ;;  %399 = vrot.lane.b32.xlu1 %v1740_v17, %s1632_s11 }
  0xfb   : > { %479 = vrot.lane.b32.xlu0 %v1740_v17, %s1634_s13  ;;  %418 = vrot.lane.b32.xlu1 %v1740_v17, %s1631_s10 }
  0xff   : > { %385 = vrot.lane.b32.xlu0 %v1740_v17, %s1633_s12  ;;  %432 = vrot.lane.b32.xlu1 %v1740_v17, %s1635_s14 }
 0x103   : > { %446 = vrot.lane.b32.xlu1 %v1740_v17, %s1637_s16  ;;  %501 = vrot.lane.b32.xlu0 %v356_v18, %s1636_s15 }
 0x107   : > { %460 = vrot.lane.b32.xlu1 %v1740_v17, %s1639_s18  ;;  %515 = vrot.lane.b32.xlu0 %v356_v18, %s1638_s17 }
 0x10b   : > { %571 = vrot.lane.b32.xlu1 %v356_v18, %s1641_s20  ;;  %529 = vrot.lane.b32.xlu0 %v356_v18, %s1640_s19 }
 0x10f   : > { %590 = vrot.lane.b32.xlu1 %v356_v18, %s1643_s24  ;;  %543 = vrot.lane.b32.xlu0 %v356_v18, %s1642_s23 }
 0x113   : > { %604 = vrot.lane.b32.xlu1 %v356_v18, %s1645_s26  ;;  %557 = vrot.lane.b32.xlu0 %v356_v18, %s1644_s25 }
 0x117   : > { %481 = vrot.lane.b32.xlu1 %v1765_v19, %s1634_s13  ;;  %401 = vrot.lane.b32.xlu0 %v1765_v19, %s1632_s11  ;;  %s1651_s11 = smov 84   ;;  %s1575_s13 = smul.u32 160, %s2134_s22 }
 0x11b   : > { %387 = vrot.lane.b32.xlu1 %v1765_v19, %s1633_s12  ;;  %420 = vrot.lane.b32.xlu0 %v1765_v19, %s1631_s10  ;;  %s1652_s12 = smov 82  }
 0x11f   : > { %434 = vrot.lane.b32.xlu0 %v1765_v19, %s1635_s14  ;;  %503 = vrot.lane.b32.xlu1 %v362_v20, %s1636_s15  ;;  %s2094_s15 = scalar_lea.vmem %s2125_s6, %s1575_s13 }
 0x123   : > { %448 = vrot.lane.b32.xlu0 %v1765_v19, %s1637_s16  ;;  %517 = vrot.lane.b32.xlu1 %v362_v20, %s1638_s17 }
 0x127   : > { %462 = vrot.lane.b32.xlu0 %v1765_v19, %s1639_s18  ;;  %531 = vrot.lane.b32.xlu1 %v362_v20, %s1640_s19 }
 0x12b   : > { %573 = vrot.lane.b32.xlu0 %v362_v20, %s1641_s20  ;;  %545 = vrot.lane.b32.xlu1 %v362_v20, %s1642_s23 }
 0x12f   : > { %592 = vrot.lane.b32.xlu0 %v362_v20, %s1643_s24  ;;  %559 = vrot.lane.b32.xlu1 %v362_v20, %s1644_s25 }
 0x133   : > { %606 = vrot.lane.b32.xlu0 %v362_v20, %s1645_s26 }
 0x137   : > { %934 = vperm.xlu0 %1608, %v931_v21  }
 0x14d   : > { %v417_v22 = vpop.permute.xlu1 %416  ;;  %v398_v23 = vpop.permute.xlu0 %397 }
 0x14e   : > { %409 = vst.msk [vmem:[#allocation2 + $0x8] sm:$0xff] %vm408_vm2, %v398_v23 }
 0x14f   : > { %426 = vst.msk [vmem:[#allocation2 + $0x8] sm:$0xff] %vm425_vm3, %v417_v22 }
 0x151   : > { %v384_v24 = vpop.permute.xlu1 %383  ;;  %v478_v25 = vpop.permute.xlu0 %477 }
 0x152   : > { %393 = vst.msk [vmem:[#allocation2] sm:$0xff] %vm392_vm4, %v384_v24 }
 0x153   : > { %489 = vst.msk [vmem:[#allocation2 + $0x10] sm:$0xff] %vm488_vm5, %v478_v25 }
 0x154   : > { %407 = vst.msk [vmem:[#allocation2] sm:$0xff] %vm406_vm6, %v398_v23 }
 0x155   : > { %v431_v26 = vpop.permute.xlu0 %430  ;;  %v500_v27 = vpop.permute.xlu1 %499 }
 0x156   : > { %440 = vst.msk [vmem:[#allocation2 + $0x8] sm:$0xff] %vm439_vm7, %v431_v26 }
 0x157   : > { %509 = vst.msk [vmem:[#allocation2 + $0x10] sm:$0xff] %vm508_vm8, %v500_v27 }
 0x159   : > { %v445_v28 = vpop.permute.xlu0 %444  ;;  %v514_v29 = vpop.permute.xlu1 %513 }
 0x15a   : > { %454 = vst.msk [vmem:[#allocation2 + $0x8] sm:$0xff] %vm453_vm9, %v445_v28 }
 0x15b   : > { %523 = vst.msk [vmem:[#allocation2 + $0x10] sm:$0xff] %vm2127_vm10, %v514_v29  ;;  %v621_v30 = vld [vmem:[#allocation2] sm:$0xc]  ;;  %v661_v32 = vld [vmem:[#allocation2] sm:$0x30]  ;;  %vm578_vm10 = vcmask 1048528  }
 0x15c   : > { %v631_v31 = vrot.slane %v621_v30, 2  ;;  %v671_v35 = vrot.slane %v661_v32, 4  ;;  %v701_v36 = vld [vmem:[#allocation2] sm:$0xc0] }
 0x15d   : > { %v459_v33 = vpop.permute.xlu0 %458  ;;  %v528_v34 = vpop.permute.xlu1 %527  ;;  %v711_v39 = vrot.slane %v701_v36, 6 }
 0x15e   : > { %636 = vrot.lane.b32.xlu0 %v631_v31, %s1646_s29  ;;  %468 = vst.msk [vmem:[#allocation2 + $0x8] sm:$0xff] %vm467_vm11, %v459_v33 }
 0x15f   : > { %537 = vst.msk [vmem:[#allocation2 + $0x10] sm:$0xff] %vm2126_vm12, %v528_v34  ;;  %vm564_vm12 = vcmask 950048  }
 0x160   : > { %473 = vst.msk [vmem:[#allocation2 + $0x8] sm:$0xff] %vm472_vm13, %v1717_v15 }
 0x161   : > { %487 = vst.msk [vmem:[#allocation2 + $0x8] sm:$0xff] %vm2128_vm14, %v478_v25  ;;  %v570_v37 = vpop.permute.xlu0 %569  ;;  %v542_v38 = vpop.permute.xlu1 %541  ;;  %vm611_vm14 = vcmask 441648  }
 0x162   : > { %676 = vrot.lane.b32.xlu0 %v671_v35, %s1647_s30  ;;  %581 = vst.msk [vmem:[#allocation2 + $0x18] sm:$0xff] %vm580_vm15, %v570_v37 }
 0x163   : > { %551 = vst.msk [vmem:[#allocation2 + $0x10] sm:$0xff] %vm550_vm0, %v542_v38 }
 0x165   : > { %v589_v40 = vpop.permute.xlu0 %588  ;;  %v556_v41 = vpop.permute.xlu1 %555 }
 0x166   : > { %716 = vrot.lane.b32.xlu0 %v711_v39, %s1648_s7  ;;  %598 = vst.msk [vmem:[#allocation2 + $0x18] sm:$0xff] %vm597_vm1, %v589_v40 }
 0x167   : > { %565 = vst.msk [vmem:[#allocation2 + $0x10] sm:$0xff] %vm564_vm12, %v556_v41 }
 0x168   : > { %579 = vst.msk [vmem:[#allocation2 + $0x10] sm:$0xff] %vm578_vm10, %v570_v37  ;;  %v622_v2 = vld [vmem:[#allocation2 + $0x8] sm:$0xc]  ;;  %v662_v8 = vld [vmem:[#allocation2 + $0x8] sm:$0x30] }
 0x169   : > { %v603_v42 = vpop.permute.xlu0 %602  ;;  %v400_v43 = vpop.permute.xlu1 %399  ;;  %v632_v6 = vrot.slane %v622_v2, 2  ;;  %v672_v12 = vrot.slane %v662_v8, 4  ;;  %v702_v14 = vld [vmem:[#allocation2 + $0x8] sm:$0xc0]  ;;  %v705_v2 = vld [vmem:[#allocation2 + $0x20] sm:$0xc0] }
 0x16a   : > { %612 = vst.msk [vmem:[#allocation2 + $0x18] sm:$0xff] %vm611_vm14, %v603_v42  ;;  %v712_v18 = vrot.slane %v702_v14, 6 }
 0x16b   : > { %411 = vst.msk [vmem:[#allocation2 + $0x30] sm:$0xff] %vm408_vm2, %v400_v43  ;;  %vm2130_vm2 = vcmask 408848  }
 0x16d   : > { %v480_v44 = vpop.permute.xlu0 %479  ;;  %v419_v45 = vpop.permute.xlu1 %418 }
 0x16e   : > { %491 = vst.msk [vmem:[#allocation2 + $0x38] sm:$0xff] %vm488_vm5, %v480_v44  ;;  %vm494_vm5 = vcmask 41984  }
 0x16f   : > { %427 = vst.msk [vmem:[#allocation2 + $0x30] sm:$0xff] %vm425_vm3, %v419_v45  ;;  %vm2131_vm3 = vcmask 1048496   ;;  %v623_v7 = vld [vmem:[#allocation2 + $0x10] sm:$0xc]  ;;  %v663_v13 = vld [vmem:[#allocation2 + $0x10] sm:$0x30] }
 0x170   : > { %v633_v11 = vrot.slane %v623_v7, 2  ;;  %v703_v20 = vld [vmem:[#allocation2 + $0x10] sm:$0xc0]  ;;  %v860_v7 = vld [vmem:[#allocation2 + $0x48] sm:$0xc0] }
 0x171   : > { %v386_v46 = vpop.permute.xlu0 %385  ;;  %v433_v47 = vpop.permute.xlu1 %432  ;;  %v624_v48 = vld [vmem:[#allocation2 + $0x18] sm:$0xc]  ;;  %v664_v50 = vld [vmem:[#allocation2 + $0x18] sm:$0x30]  ;;  %v704_v54 = vld [vmem:[#allocation2 + $0x18] sm:$0xc0] }
 0x172   : > { %394 = vst.msk [vmem:[#allocation2 + $0x28] sm:$0xff] %vm392_vm4, %v386_v46  ;;  %v634_v49 = vrot.slane %v624_v48, 2  ;;  %v674_v53 = vrot.slane %v664_v50, 4  ;;  %v714_v58 = vrot.slane %v704_v54, 6  ;;  %vm2132_vm4 = vcmask 589248  }
 0x173   : > { %441 = vst.msk [vmem:[#allocation2 + $0x30] sm:$0xff] %vm439_vm7, %v433_v47  ;;  %vm395_vm7 = vcmask 878304   ;;  %v713_v23 = vrot.slane %v703_v20, 6  ;;  %v870_v8 = vrot.slane %v860_v7, 6 }
 0x174   : > { %410 = vst.msk [vmem:[#allocation2 + $0x28] sm:$0xff] %vm406_vm6, %v400_v43  ;;  %642 = vrot.lane.b32.xlu1 %v634_v49, %s1646_s29  ;;  %vm414_vm6 = vcmask 9216  }
 0x175   : > { %v447_v51 = vpop.permute.xlu1 %446  ;;  %v502_v52 = vpop.permute.xlu0 %501 }
 0x176   : > { %455 = vst.msk [vmem:[#allocation2 + $0x30] sm:$0xff] %vm453_vm9, %v447_v51  ;;  %vm412_vm9 = vcmask 1042320  }
 0x177   : > { %510 = vst.msk [vmem:[#allocation2 + $0x38] sm:$0xff] %vm508_vm8, %v502_v52  ;;  %vm428_vm8 = vcmask 189504  }
 0x178   : > { %682 = vrot.lane.b32.xlu1 %v674_v53, %s1647_s30 }
 0x179   : > { %v461_v55 = vpop.permute.xlu1 %460  ;;  %v516_v56 = vpop.permute.xlu0 %515 }
 0x17a   : > { %469 = vst.msk [vmem:[#allocation2 + $0x30] sm:$0xff] %vm467_vm11, %v461_v55  ;;  %vm511_vm11 = vcmask 222304   ;;  %v665_v55 = vld [vmem:[#allocation2 + $0x20] sm:$0x30] }
 0x17b   : > { %524 = vst.msk [vmem:[#allocation2 + $0x38] sm:$0xff] %vm2130_vm2, %v516_v56  ;;  %v741_v57 = vld [vmem:[#allocation2 + $0x28] sm:$0x3]  ;;  %v776_v59 = vld [vmem:[#allocation2 + $0x28] sm:$0xc]  ;;  %vm586_vm2 = vcmask 74752  }
 0x17c   : > { %474 = vst.msk [vmem:[#allocation2 + $0x30] sm:$0xff] %vm472_vm13, %v1740_v17  ;;  %751 = vrot.lane.b32.xlu0 %v741_v57, %s1649_s8  ;;  %v856_v60 = vld [vmem:[#allocation2 + $0x28] sm:$0xc0]  ;;  %722 = vrot.lane.b32.xlu1 %v714_v58, %s1648_s7  ;;  %v786_v63 = vrot.slane %v776_v59, 2  ;;  %v816_v1 = vld [vmem:[#allocation2 + $0x28] sm:$0x30] }
 0x17d   : > { %490 = vst.msk [vmem:[#allocation2 + $0x30] sm:$0xff] %vm2131_vm3, %v480_v44  ;;  %v572_v61 = vpop.permute.xlu1 %571  ;;  %v530_v62 = vpop.permute.xlu0 %529  ;;  %v866_v0 = vrot.slane %v856_v60, 6  ;;  %v826_v5 = vrot.slane %v816_v1, 4  ;;  %v673_v17 = vrot.slane %v663_v13, 4  ;;  %vm525_vm13 = vcmask 402704  }
 0x17e   : > { %583 = vst.msk [vmem:[#allocation2 + $0x40] sm:$0xff] %vm580_vm15, %v572_v61  ;;  %vm539_vm15 = vcmask 583104   ;;  %vm553_vm3 = vcmask 763504   ;;  %v675_v58 = vrot.slane %v665_v55, 4  ;;  %v745_v60 = vld [vmem:[#allocation2 + $0x48] sm:$0x3] }
 0x17f   : > { %538 = vst.msk [vmem:[#allocation2 + $0x38] sm:$0xff] %vm2132_vm4, %v530_v62  ;;  %vm600_vm4 = vcmask 255104   ;;  %v625_v62 = vld [vmem:[#allocation2 + $0x20] sm:$0xc] }
 0x180   : > { %791 = vrot.lane.b32.xlu0 %v786_v63, %s1631_s10  ;;  %871 = vrot.lane.b32.xlu1 %v866_v0, %s1650_s9  ;;  %v635_v1 = vrot.slane %v625_v62, 2 }
 0x181   : > { %v591_v3 = vpop.permute.xlu1 %590  ;;  %v544_v4 = vpop.permute.xlu0 %543 }
 0x182   : > { %599 = vst.msk [vmem:[#allocation2 + $0x40] sm:$0xff] %vm597_vm1, %v591_v3  ;;  %vm492_vm1 = vcmask 1042352   ;;  %v900_v3 = vld [vmem:[#allocation2 + $0x70] sm:$0x3] }
 0x183   : > { %552 = vst.msk [vmem:[#allocation2 + $0x38] sm:$0xff] %vm550_vm0, %v544_v4  ;;  %vm475_vm0 = vcmask 911104   ;;  %v715_v4 = vrot.slane %v705_v2, 6 }
 0x184   : > { %831 = vrot.lane.b32.xlu0 %v826_v5, %s1651_s11  ;;  %638 = vrot.lane.b32.xlu1 %v632_v6, %s1646_s29  ;;  %v742_v27 = vld [vmem:[#allocation2 + $0x30] sm:$0x3]  ;;  %v817_v50 = vld [vmem:[#allocation2 + $0x30] sm:$0x30]  ;;  %v857_v54 = vld [vmem:[#allocation2 + $0x30] sm:$0xc0] }
 0x185   : > { %v605_v9 = vpop.permute.xlu1 %604  ;;  %v558_v10 = vpop.permute.xlu0 %557  ;;  %v827_v53 = vrot.slane %v817_v50, 4  ;;  %v867_v57 = vrot.slane %v857_v54, 6  ;;  %v780_v5 = vld [vmem:[#allocation2 + $0x48] sm:$0xc] }
 0x186   : > { %613 = vst.msk [vmem:[#allocation2 + $0x40] sm:$0xff] %vm611_vm14, %v605_v9  ;;  %vm470_vm14 = vcmask 730704   ;;  %v790_v6 = vrot.slane %v780_v5, 2 }
 0x187   : > { %566 = vst.msk [vmem:[#allocation2 + $0x38] sm:$0xff] %vm564_vm12, %v558_v10  ;;  %vm456_vm12 = vcmask 550304  }
 0x188   : > { %582 = vst.msk [vmem:[#allocation2 + $0x38] sm:$0xff] %vm578_vm10, %v572_v61  ;;  %640 = vrot.lane.b32.xlu0 %v633_v11, %s1646_s29  ;;  %678 = vrot.lane.b32.xlu1 %v672_v12, %s1647_s30  ;;  %vm442_vm10 = vcmask 369904   ;;  %v820_v61 = vld [vmem:[#allocation2 + $0x48] sm:$0x30] }
 0x189   : > { %v482_v15 = vpop.permute.xlu1 %481  ;;  %v402_v16 = vpop.permute.xlu0 %401  ;;  %v830_v0 = vrot.slane %v820_v61, 4 }
 0x18a   : > { %495 = vst.msk [vmem:[#allocation2 + $0x60] sm:$0x3] %vm494_vm5, %v482_v15  ;;  %vm567_vm5 = vcmask 943904  }
 0x18b   : > { %415 = vst.msk [vmem:[#allocation2 + $0x58] sm:$0x3] %vm414_vm6, %v402_v16  ;;  %vm584_vm6 = vcmask 1042384  }
 0x18c   : > { %680 = vrot.lane.b32.xlu0 %v673_v17, %s1647_s30  ;;  %718 = vrot.lane.b32.xlu1 %v712_v18, %s1648_s7 }
 0x18d   : > { %v388_v21 = vpop.permute.xlu1 %387  ;;  %v421_v22 = vpop.permute.xlu0 %420  ;;  %v744_v24 = vld [vmem:[#allocation2 + $0x40] sm:$0x3]  ;;  %v779_v28 = vld [vmem:[#allocation2 + $0x40] sm:$0xc]  ;;  %v819_v33 = vld [vmem:[#allocation2 + $0x40] sm:$0x30] }
 0x18e   : > { %396 = vst.msk [vmem:[#allocation2 + $0x50] sm:$0x3] %vm395_vm7, %v388_v21  ;;  %v789_v32 = vrot.slane %v779_v28, 2  ;;  %v829_v37 = vrot.slane %v819_v33, 4  ;;  %v859_v39 = vld [vmem:[#allocation2 + $0x40] sm:$0xc0] }
 0x18f   : > { %429 = vst.msk [vmem:[#allocation2 + $0x58] sm:$0x3] %vm428_vm8, %v421_v22  ;;  %v743_v36 = vld [vmem:[#allocation2 + $0x38] sm:$0x3]  ;;  %v778_v38 = vld [vmem:[#allocation2 + $0x38] sm:$0xc] }
 0x190   : > { %413 = vst.msk [vmem:[#allocation2 + $0x50] sm:$0x3] %vm412_vm9, %v402_v16  ;;  %720 = vrot.lane.b32.xlu0 %v713_v23, %s1648_s7  ;;  %757 = vrot.lane.b32.xlu1 %v744_v24, %s1649_s8  ;;  %v788_v42 = vrot.slane %v778_v38, 2  ;;  %v869_v43 = vrot.slane %v859_v39, 6  ;;  %v818_v44 = vld [vmem:[#allocation2 + $0x38] sm:$0x30] }
 0x191   : > { %v435_v25 = vpop.permute.xlu0 %434  ;;  %v504_v26 = vpop.permute.xlu1 %503  ;;  %v828_v47 = vrot.slane %v818_v44, 4  ;;  %v858_v49 = vld [vmem:[#allocation2 + $0x38] sm:$0xc0]  ;;  %vm614_vm7 = vcmask 435504   ;;  %vm646_vm8 = vcmask 1039360   ;;  %vm686_vm9 = vcmask 1031168  }
 0x192   : > { %443 = vst.msk [vmem:[#allocation2 + $0x58] sm:$0x3] %vm442_vm10, %v435_v25  ;;  %v868_v52 = vrot.slane %v858_v49, 6  ;;  %vm726_vm10 = vcmask 867328  }
 0x193   : > { %512 = vst.msk [vmem:[#allocation2 + $0x60] sm:$0x3] %vm511_vm11, %v504_v26  ;;  %vm761_vm11 = vcmask 859136  }
 0x194   : > { %753 = vrot.lane.b32.xlu1 %v742_v27, %s1649_s8 }
 0x195   : > { %v449_v29 = vpop.permute.xlu0 %448  ;;  %v518_v30 = vpop.permute.xlu1 %517 }
 0x196   : > { %457 = vst.msk [vmem:[#allocation2 + $0x58] sm:$0x3] %vm456_vm12, %v449_v29  ;;  %vm801_vm12 = vcmask 850944  }
 0x197   : > { %526 = vst.msk [vmem:[#allocation2 + $0x60] sm:$0x3] %vm525_vm13, %v518_v30  ;;  %v896_v31 = vld [vmem:[#allocation2 + $0x50] sm:$0x3]  ;;  %vm841_vm13 = vcmask 687104  }
 0x198   : > { %906 = vrot.lane.b32.xlu0 %v896_v31, %s1652_s12  ;;  %797 = vrot.lane.b32.xlu1 %v789_v32, %s1631_s10 }
 0x199   : > { %v463_v34 = vpop.permute.xlu0 %462  ;;  %v532_v35 = vpop.permute.xlu1 %531 }
 0x19a   : > { %471 = vst.msk [vmem:[#allocation2 + $0x58] sm:$0x3] %vm470_vm14, %v463_v34  ;;  %vm881_vm14 = vcmask 678912  }
 0x19b   : > { %540 = vst.msk [vmem:[#allocation2 + $0x60] sm:$0x3] %vm539_vm15, %v532_v35  ;;  %vm916_vm15 = vcmask 670720  }
 0x19c   : > { %476 = vst.msk [vmem:[#allocation2 + $0x58] sm:$0x3] %vm475_vm0, %v1765_v19  ;;  %755 = vrot.lane.b32.xlu0 %v743_v36, %s1649_s8  ;;  %837 = vrot.lane.b32.xlu1 %v829_v37, %s1651_s11  ;;  %v777_v19 = vld [vmem:[#allocation2 + $0x30] sm:$0xc]  ;;  %v618_v36 = vld [vmem:[#allocation2 + $0x10] sm:$0x3] }
 0x19d   : > { %493 = vst.msk [vmem:[#allocation2 + $0x58] sm:$0x3] %vm492_vm1, %v482_v15  ;;  %v574_v40 = vpop.permute.xlu0 %573  ;;  %v546_v41 = vpop.permute.xlu1 %545  ;;  %v787_v48 = vrot.slane %v777_v19, 2  ;;  %v616_v19 = vld [vmem:[#allocation2] sm:$0x3]  ;;  %vm1262_vm0 = vcmask 1041408  }
 0x19e   : > { %587 = vst.msk [vmem:[#allocation2 + $0x68] sm:$0x3] %vm586_vm2, %v574_v40  ;;  %vm1246_vm1 = vcmask 146432  }
 0x19f   : > { %554 = vst.msk [vmem:[#allocation2 + $0x60] sm:$0x3] %vm553_vm3, %v546_v41 }
 0x1a0   : > { %795 = vrot.lane.b32.xlu0 %v788_v42, %s1631_s10  ;;  %877 = vrot.lane.b32.xlu1 %v869_v43, %s1650_s9 }
 0x1a1   : > { %v593_v45 = vpop.permute.xlu0 %592  ;;  %v560_v46 = vpop.permute.xlu1 %559 }
 0x1a2   : > { %601 = vst.msk [vmem:[#allocation2 + $0x68] sm:$0x3] %vm600_vm4, %v593_v45  ;;  %v617_v45 = vld [vmem:[#allocation2 + $0x8] sm:$0x3] }
 0x1a3   : > { %568 = vst.msk [vmem:[#allocation2 + $0x60] sm:$0x3] %vm567_vm5, %v560_v46 }
 0x1a4   : > { %585 = vst.msk [vmem:[#allocation2 + $0x60] sm:$0x3] %vm584_vm6, %v574_v40  ;;  %835 = vrot.lane.b32.xlu0 %v828_v47, %s1651_s11  ;;  %793 = vrot.lane.b32.xlu1 %v787_v48, %s1631_s10  ;;  %v897_v63 = vld [vmem:[#allocation2 + $0x58] sm:$0x3] }
 0x1a5   : > { %v607_v51 = vpop.permute.xlu0 %606 }
 0x1a6   : > { %615 = vst.msk [vmem:[#allocation2 + $0x68] sm:$0x3] %vm614_vm7, %v607_v51 }
 0x1a8   : > { %875 = vrot.lane.b32.xlu0 %v868_v52, %s1650_s9  ;;  %833 = vrot.lane.b32.xlu1 %v827_v53, %s1651_s11 }
 0x1ab   : > { %v898_v56 = vld [vmem:[#allocation2 + $0x60] sm:$0x3] }
 0x1ac   : > { %910 = vrot.lane.b32.xlu0 %v898_v56, %s1652_s12  ;;  %873 = vrot.lane.b32.xlu1 %v867_v57, %s1650_s9 }
 0x1ad   : > { %v899_v59 = vld [vmem:[#allocation2 + $0x68] sm:$0x3] }
 0x1b0   : > { %684 = vrot.lane.b32.xlu0 %v675_v58, %s1647_s30  ;;  %912 = vrot.lane.b32.xlu1 %v899_v59, %s1652_s12 }
 0x1b2   : > { %v1873_v9 = vpop.permute.xlu0 %934 }
 0x1b4   : > { %759 = vrot.lane.b32.xlu0 %v745_v60, %s1649_s8  ;;  %908 = vrot.lane.b32.xlu1 %v897_v63, %s1652_s12 }
 0x1b8   : > { %839 = vrot.lane.b32.xlu0 %v830_v0, %s1651_s11  ;;  %644 = vrot.lane.b32.xlu1 %v635_v1, %s1646_s29 }
 0x1bc   : > { %914 = vrot.lane.b32.xlu0 %v900_v3, %s1652_s12  ;;  %724 = vrot.lane.b32.xlu1 %v715_v4, %s1648_s7 }
 0x1c0   : > { %799 = vrot.lane.b32.xlu1 %v790_v6, %s1631_s10 }
 0x1c4   : > { %879 = vrot.lane.b32.xlu1 %v870_v8, %s1650_s9 }
 0x1d0   : > { %v637_v10 = vpop.permute.xlu0 %636 }
 0x1d4   : > { %v677_v11 = vpop.permute.xlu0 %676 }
 0x1d8   : > { %v717_v13 = vpop.permute.xlu0 %716 }
 0x1e6   : > { %v1875_v12 = vpop.permute.xlu1 %642 }
 0x1ea   : > { %v1877_v14 = vpop.permute.xlu1 %682 }
 0x1ee   : > { %v752_v15 = vpop.permute.xlu0 %751  ;;  %v1879_v16 = vpop.permute.xlu1 %722 }
 0x1f2   : > { %v792_v17 = vpop.permute.xlu0 %791  ;;  %v1881_v18 = vpop.permute.xlu1 %871 }
 0x1f6   : > { %v1883_v20 = vpop.permute.xlu0 %831  ;;  %v639_v21 = vpop.permute.xlu1 %638 }
 0x1f7   : > { %v647_v41 = vsel %vm646_vm8, %v637_v10, %v639_v21 }
 0x1f8   : > { %v656_v50 = vadd.f32 %v647_v41, %v616_v19 }
 0x1fa   : > { %v641_v22 = vpop.permute.xlu0 %640  ;;  %v679_v23 = vpop.permute.xlu1 %678 }
 0x1fb   : > { %v649_v35 = vsel %vm646_vm8, %v641_v22, %v1875_v12  ;;  %v648_v42 = vsel %vm646_vm8, %v639_v21, %v641_v22  ;;  %v687_v46 = vsel %vm686_vm9, %v677_v11, %v679_v23 }
 0x1fc   : > { %v658_v39 = vadd.f32 %v649_v35, %v618_v36  ;;  %v657_v51 = vadd.f32 %v648_v42, %v617_v45  ;;  %v696_v57 = vadd.f32 %v687_v46, %v656_v50  ;;  %v620_v42 = vld [vmem:[#allocation2 + $0x20] sm:$0x3]  ;;  %v619_v50 = vld [vmem:[#allocation2 + $0x18] sm:$0x3] }
 0x1fe   : > { %v719_v24 = vpop.permute.xlu1 %718  ;;  %v681_v25 = vpop.permute.xlu0 %680 }
 0x1ff   : > { %v689_v37 = vsel %vm686_vm9, %v681_v25, %v1877_v14  ;;  %v688_v47 = vsel %vm686_vm9, %v679_v23, %v681_v25  ;;  %v727_v54 = vsel %vm726_vm10, %v717_v13, %v719_v24 }
 0x200   : > { %v698_v44 = vadd.f32 %v689_v37, %v658_v39  ;;  %v697_v58 = vadd.f32 %v688_v47, %v657_v51  ;;  %v736_v63 = vadd.f32 %v727_v54, %v696_v57 }
 0x202   : > { %v1885_v26 = vpop.permute.xlu1 %757  ;;  %v721_v27 = vpop.permute.xlu0 %720 }
 0x203   : > { %v729_v43 = vsel %vm726_vm10, %v721_v27, %v1879_v16  ;;  %v728_v55 = vsel %vm726_vm10, %v719_v24, %v721_v27 }
 0x204   : > { %v738_v52 = vadd.f32 %v729_v43, %v698_v44  ;;  %v737_v0 = vadd.f32 %v728_v55, %v697_v58 }
 0x206   : > { %v754_v28 = vpop.permute.xlu1 %753 }
 0x207   : > { %v762_v60 = vsel %vm761_vm11, %v752_v15, %v754_v28 }
 0x208   : > { %v771_v7 = vadd.f32 %v762_v60, %v736_v63 }
 0x20a   : > { %v1887_v29 = vpop.permute.xlu0 %906  ;;  %v1889_v30 = vpop.permute.xlu1 %797 }
 0x20e   : > { %v756_v31 = vpop.permute.xlu0 %755  ;;  %v1891_v32 = vpop.permute.xlu1 %837 }
 0x20f   : > { %v764_v48 = vsel %vm761_vm11, %v756_v31, %v1885_v26  ;;  %v763_v61 = vsel %vm761_vm11, %v754_v28, %v756_v31 }
 0x210   : > { %v773_v59 = vadd.f32 %v764_v48, %v738_v52  ;;  %v772_v8 = vadd.f32 %v763_v61, %v737_v0  ;;  %v969_v48 = vlaneseq }
 0x212   : > { %v796_v33 = vpop.permute.xlu0 %795  ;;  %v1893_v34 = vpop.permute.xlu1 %877  ;;  %v970_v58 = vshrl.u32 %v969_v48, 7 }
 0x213   : > { %v804_v56 = vsel %vm801_vm12, %v796_v33, %v1889_v30 }
 0x214   : > { %v813_v1 = vadd.f32 %v804_v56, %v773_v59 }
 0x216   : > { %v836_v38 = vpop.permute.xlu0 %835  ;;  %v794_v40 = vpop.permute.xlu1 %793 }
 0x217   : > { %v844_v62 = vsel %vm841_vm13, %v836_v38, %v1891_v32  ;;  %v802_v3 = vsel %vm801_vm12, %v792_v17, %v794_v40  ;;  %v803_v4 = vsel %vm801_vm12, %v794_v40, %v796_v33 }
 0x218   : > { %v853_v10 = vadd.f32 %v844_v62, %v813_v1  ;;  %v811_v15 = vadd.f32 %v802_v3, %v771_v7  ;;  %v812_v21 = vadd.f32 %v803_v4, %v772_v8  ;;  %v979_v1 = vsub.s32 2, %v970_v58 }
 0x219   : > { %v971_v7 = vsub.s32 0, %v970_v58 }
 0x21a   : > { %v876_v49 = vpop.permute.xlu0 %875  ;;  %v834_v53 = vpop.permute.xlu1 %833 }
 0x21b   : > { %v884_v5 = vsel %vm881_vm14, %v876_v49, %v1893_v34  ;;  %v842_v11 = vsel %vm841_vm13, %v1883_v20, %v834_v53  ;;  %v843_v13 = vsel %vm841_vm13, %v834_v53, %v836_v38 }
 0x21c   : > { %v893_v22 = vadd.f32 %v884_v5, %v853_v10  ;;  %v851_v27 = vadd.f32 %v842_v11, %v811_v15  ;;  %v852_v28 = vadd.f32 %v843_v13, %v812_v21  ;;  %v975_v21 = vsub.s32 1, %v970_v58 }
 0x21e   : > { %v874_v2 = vpop.permute.xlu1 %873  ;;  %v911_v6 = vpop.permute.xlu0 %910 }
 0x21f   : > { %v882_v17 = vsel %vm881_vm14, %v1881_v18, %v874_v2  ;;  %v883_v24 = vsel %vm881_vm14, %v874_v2, %v876_v49  ;;  %v967_v2 = vld [vmem:[%s2124_s5] sm:$0x1f] }
 0x220   : > { %v891_v20 = vadd.f32 %v882_v17, %v851_v27  ;;  %v892_v35 = vadd.f32 %v883_v24, %v852_v28  ;;  %v980_v11 = vrot.slane %v967_v2, %v979_v1  ;;  %v972_v27 = vrot.slane %v967_v2, %v971_v7  ;;  %v1220_v7 = vld [vmem:[%s2123_s4 + $0x20] sm:$0x7] }
 0x222   : > { %v1922_v23 = vpop.permute.xlu1 %912  ;;  %v685_v33 = vpop.permute.xlu0 %684 }
 0x223   : > { %v919_v25 = vsel %vm916_vm15, %v911_v6, %v1922_v23  ;;  %v690_v53 = vsel %vm686_vm9, %v1877_v14, %v685_v33 }
 0x224   : > { %v928_v31 = vadd.f32 %v919_v25, %v893_v22 }
 0x226   : > { %v939_v36 = vadd.f32 %v1873_v9, %v928_v31  ;;  %v909_v37 = vpop.permute.xlu1 %908  ;;  %v760_v45 = vpop.permute.xlu0 %759 }
 0x227   : > { %v917_v38 = vsel %vm916_vm15, %v1887_v29, %v909_v37  ;;  %v918_v39 = vsel %vm916_vm15, %v909_v37, %v911_v6  ;;  %v765_v61 = vsel %vm761_vm11, %v1885_v26, %v760_v45 }
 0x228   : > { %v949_v18 = vmul.f32 0.70710677, %v939_v36  ;;  %v926_v40 = vadd.f32 %v917_v38, %v891_v20  ;;  %v927_v41 = vadd.f32 %v918_v39, %v892_v35  ;;  %v944_v13 = vmul.f32 0.5, %v939_v36 }
 0x22a   : > { %1610 = verf.f32 %v949_v18  ;;  %v937_v43 = vadd.f32 %v1873_v9, %v926_v40  ;;  %v938_v44 = vadd.f32 %v1873_v9, %v927_v41  ;;  %v645_v19 = vpop.permute.xlu1 %644 }
 0x22b   : > { %v650_v46 = vsel %vm646_vm8, %v1875_v12, %v645_v19  ;;  %v660_v47 = vadd.f32 %v645_v19, %v620_v42  ;;  %v840_v12 = vpop.permute.xlu0 %839 }
 0x22c   : > { %v947_v49 = vmul.f32 0.70710677, %v937_v43  ;;  %v948_v29 = vmul.f32 0.70710677, %v938_v44  ;;  %v659_v51 = vadd.f32 %v650_v46, %v619_v50  ;;  %v845_v4 = vsel %vm841_vm13, %v1891_v32, %v840_v12 }
 0x22d   : > { %v700_v52 = vadd.f32 %v685_v33, %v660_v47  ;;  %v942_v35 = vmul.f32 0.5, %v937_v43  ;;  %v943_v36 = vmul.f32 0.5, %v938_v44  ;;  %v983_v46 = vsub.s32 3, %v970_v58 }
 0x22e   : > { %1612 = verf.f32 %v947_v49  ;;  %v725_v54 = vpop.permute.xlu1 %724  ;;  %v699_v55 = vadd.f32 %v690_v53, %v659_v51 }
 0x22f   : > { %1614 = verf.f32 %v948_v29  ;;  %v730_v56 = vsel %vm726_vm10, %v1879_v16, %v725_v54  ;;  %v740_v57 = vadd.f32 %v725_v54, %v700_v52  ;;  %v915_v26 = vpop.permute.xlu0 %914 }
 0x230   : > { %v739_v59 = vadd.f32 %v730_v56, %v699_v55  ;;  %v920_v25 = vsel %vm916_vm15, %v1922_v23, %v915_v26 }
 0x231   : > { %v775_v60 = vadd.f32 %v760_v45, %v740_v57  ;;  %v987_v45 = vsub.s32 4, %v970_v58 }
 0x232   : > { %v800_v62 = vpop.permute.xlu1 %799  ;;  %v774_v63 = vadd.f32 %v765_v61, %v739_v59 }
 0x233   : > { %v805_v14 = vsel %vm801_vm12, %v1889_v30, %v800_v62  ;;  %v815_v0 = vadd.f32 %v800_v62, %v775_v60  ;;  %v988_v47 = vrot.slane %v967_v2, %v987_v45 }
 0x234   : > { %v814_v16 = vadd.f32 %v805_v14, %v774_v63 }
 0x235   : > { %v855_v3 = vadd.f32 %v840_v12, %v815_v0 }
 0x236   : > { %v880_v5 = vpop.permute.xlu1 %879  ;;  %v854_v8 = vadd.f32 %v845_v4, %v814_v16  ;;  %v1219_v4 = vld [vmem:[%s2123_s4 + $0x18] sm:$0xff] }
 0x237   : > { %v1611_v6 = vpop.eup %1610  ;;  %v885_v10 = vsel %vm881_vm14, %v1893_v34, %v880_v5  ;;  %v895_v30 = vadd.f32 %v880_v5, %v855_v3  ;;  %v976_v34 = vrot.slane %v967_v2, %v975_v21  ;;  %v1217_v3 = vld [vmem:[%s2123_s4 + $0x8] sm:$0xff]  ;;  %v1216_v5 = vld [vmem:[%s2123_s4] sm:$0xff] }
 0x238   : > { %v959_v15 = vadd.f32 1.0, %v1611_v6  ;;  %v894_v22 = vadd.f32 %v885_v10, %v854_v8  ;;  %v1218_v6 = vld [vmem:[%s2123_s4 + $0x10] sm:$0xff] }
 0x239   : > { %v930_v17 = vadd.f32 %v915_v26, %v895_v30 }
 0x23a   : > { %v964_v24 = vmul.f32 %v959_v15, %v944_v13  ;;  %v929_v28 = vadd.f32 %v920_v25, %v894_v22 }
 0x23b   : > { %v1613_v32 = vpop.eup %1612  ;;  %v941_v31 = vadd.f32 %v1873_v9, %v930_v17 }
 0x23c   : > { %v1615_v33 = vpop.eup %1614  ;;  %v1955_v20 = vmul.f32 %v980_v11, %v964_v24  ;;  %v957_v37 = vadd.f32 1.0, %v1613_v32  ;;  %v940_v39 = vadd.f32 %v1873_v9, %v929_v28  ;;  %v984_v9 = vrot.slane %v967_v2, %v983_v46 }
 0x23d   : > { %v958_v38 = vadd.f32 1.0, %v1615_v33  ;;  %v951_v18 = vmul.f32 0.70710677, %v941_v31  ;;  %v946_v44 = vmul.f32 0.5, %v941_v31 }
 0x23e   : > { %1001 = vst [vmem:[#allocation3 + $0x58] sm:$0x3] %v1955_v20  ;;  %v962_v40 = vmul.f32 %v957_v37, %v942_v35  ;;  %v950_v41 = vmul.f32 0.70710677, %v940_v39  ;;  %v945_v29 = vmul.f32 0.5, %v940_v39  ;;  %v1010_v62 = vrot.slane %v1955_v20, 6 }
 0x23f   : > { %v963_v23 = vmul.f32 %v958_v38, %v943_v36  ;;  %1616 = verf.f32 %v951_v18  ;;  %v1037_v14 = vrot.slane %v1955_v20, 4  ;;  %v1064_v1 = vrot.slane %v1955_v20, 2 }
 0x240   : > { %v994_v42 = vmul.f32 %v972_v27, %v962_v40  ;;  %1618 = verf.f32 %v950_v41 }
 0x241   : > { %v995_v19 = vmul.f32 %v976_v34, %v963_v23 }
 0x242   : > { %999 = vst [vmem:[#allocation3 + $0x30] sm:$0x3] %v994_v42  ;;  %v1035_v12 = vrot.slane %v994_v42, 4  ;;  %v1008_v59 = vrot.slane %v994_v42, 6  ;;  %v1062_v60 = vrot.slane %v994_v42, 2 }
 0x243   : > { %1000 = vst [vmem:[#allocation3] sm:$0x3] %v995_v19  ;;  %v1009_v61 = vrot.slane %v995_v19, 6  ;;  %v1036_v63 = vrot.slane %v995_v19, 4  ;;  %v1063_v0 = vrot.slane %v995_v19, 2 }
 0x24c   : > { %v1617_v43 = vpop.eup %1616 }
 0x24d   : > { %v961_v48 = vadd.f32 1.0, %v1617_v43  ;;  %v1619_v49 = vpop.eup %1618 }
 0x24e   : > { %v960_v50 = vadd.f32 1.0, %v1619_v49 }
 0x24f   : > { %v966_v51 = vmul.f32 %v961_v48, %v946_v44 }
 0x250   : > { %v965_v52 = vmul.f32 %v960_v50, %v945_v29 }
 0x251   : > { %v998_v53 = vmul.f32 %v988_v47, %v966_v51 }
 0x252   : > { %v997_v54 = vmul.f32 %v984_v9, %v965_v52 }
 0x253   : > { %1185 = vrot.lane.b32.xlu0 %v998_v53, %s1652_s12  ;;  %v1012_v55 = vrot.slane %v998_v53, 6  ;;  %v1039_v56 = vrot.slane %v998_v53, 4  ;;  %v1066_v2 = vrot.slane %v998_v53, 2 }
 0x254   : > { %1002 = vst [vmem:[#allocation3 + $0x18] sm:$0x3] %v997_v54  ;;  %1183 = vrot.lane.b32.xlu1 %v997_v54, %s1652_s12  ;;  %v1011_v57 = vrot.slane %v997_v54, 6  ;;  %v1038_v58 = vrot.slane %v997_v54, 4  ;;  %v1065_v16 = vrot.slane %v997_v54, 2 }
 0x257   : > { %1097 = vrot.lane.b32.xlu0 %v998_v53, %s1649_s8 }
 0x258   : > { %1095 = vrot.lane.b32.xlu1 %v997_v54, %s1649_s8 }
 0x25b   : > { %1119 = vrot.lane.b32.xlu0 %v1012_v55, %s1631_s10 }
 0x25c   : > { %1177 = vrot.lane.b32.xlu1 %v994_v42, %s1652_s12 }
 0x25f   : > { %1141 = vrot.lane.b32.xlu0 %v1039_v56, %s1651_s11 }
 0x260   : > { %1117 = vrot.lane.b32.xlu1 %v1011_v57, %s1631_s10 }
 0x263   : > { %1089 = vrot.lane.b32.xlu0 %v994_v42, %s1649_s8 }
 0x264   : > { %1139 = vrot.lane.b32.xlu1 %v1038_v58, %s1651_s11 }
 0x267   : > { %1181 = vrot.lane.b32.xlu0 %v1955_v20, %s1652_s12 }
 0x268   : > { %1179 = vrot.lane.b32.xlu1 %v995_v19, %s1652_s12 }
 0x26b   : > { %1091 = vrot.lane.b32.xlu0 %v995_v19, %s1649_s8 }
 0x26c   : > { %1093 = vrot.lane.b32.xlu1 %v1955_v20, %s1649_s8 }
 0x26f   : > { %1133 = vrot.lane.b32.xlu0 %v1035_v12, %s1651_s11 }
 0x270   : > { %1111 = vrot.lane.b32.xlu1 %v1008_v59, %s1631_s10 }
 0x273   : > { %1013 = vrot.lane.b32.xlu0 %v1008_v59, %s1646_s29 }
 0x274   : > { %1155 = vrot.lane.b32.xlu1 %v1062_v60, %s1650_s9 }
 0x277   : > { %1067 = vrot.lane.b32.xlu0 %v1062_v60, %s1648_s7 }
 0x278   : > { %1040 = vrot.lane.b32.xlu1 %v1035_v12, %s1647_s30 }
 0x27b   : > { %1113 = vrot.lane.b32.xlu0 %v1009_v61, %s1631_s10 }
 0x27c   : > { %1115 = vrot.lane.b32.xlu1 %v1010_v62, %s1631_s10 }
 0x27f   : > { %1135 = vrot.lane.b32.xlu0 %v1036_v63, %s1651_s11 }
 0x280   : > { %1137 = vrot.lane.b32.xlu1 %v1037_v14, %s1651_s11 }
 0x283   : > { %1157 = vrot.lane.b32.xlu0 %v1063_v0, %s1650_s9 }
 0x284   : > { %1159 = vrot.lane.b32.xlu1 %v1064_v1, %s1650_s9 }
 0x287   : > { %1015 = vrot.lane.b32.xlu0 %v1009_v61, %s1646_s29 }
 0x288   : > { %1017 = vrot.lane.b32.xlu1 %v1010_v62, %s1646_s29 }
 0x28b   : > { %1042 = vrot.lane.b32.xlu0 %v1036_v63, %s1647_s30 }
 0x28c   : > { %1044 = vrot.lane.b32.xlu1 %v1037_v14, %s1647_s30 }
 0x28f   : > { %1069 = vrot.lane.b32.xlu0 %v1063_v0, %s1648_s7 }
 0x290   : > { %1071 = vrot.lane.b32.xlu1 %v1064_v1, %s1648_s7 }
 0x293   : > { %1163 = vrot.lane.b32.xlu0 %v1066_v2, %s1650_s9 }
 0x294   : > { %1161 = vrot.lane.b32.xlu1 %v1065_v16, %s1650_s9 }
 0x297   : > { %1021 = vrot.lane.b32.xlu0 %v1012_v55, %s1646_s29 }
 0x298   : > { %1019 = vrot.lane.b32.xlu1 %v1011_v57, %s1646_s29 }
 0x29b   : > { %1048 = vrot.lane.b32.xlu0 %v1039_v56, %s1647_s30 }
 0x29c   : > { %1046 = vrot.lane.b32.xlu1 %v1038_v58, %s1647_s30 }
 0x29f   : > { %1075 = vrot.lane.b32.xlu0 %v1066_v2, %s1648_s7 }
 0x2a0   : > { %1073 = vrot.lane.b32.xlu1 %v1065_v16, %s1648_s7 }
 0x2a3   : > { %1228 = vperm.xlu0 %1608, %v1217_v3  }
 0x2a4   : > { %1223 = vperm.xlu1 %1609, %v1216_v5  }
 0x2a7   : > { %1238 = vperm.xlu0 %1608, %v1219_v4  }
 0x2a8   : > { %1233 = vperm.xlu1 %1609, %v1218_v6  }
 0x2ac   : > { %1243 = vperm.xlu1 %1609, %v1220_v7  }
 0x2c5   : > { %v1186_v26 = vpop.permute.xlu0 %1185 }
 0x2c6   : > { %v1184_v8 = vpop.permute.xlu1 %1183 }
 0x2c7   : > { %v1190_v10 = vsel %vm916_vm15, %v1184_v8, %v1186_v26 }
 0x2c8   : > { %1198 = vst [vmem:[#allocation3 + $0x40] sm:$0x3] %v1190_v10 }
 0x2c9   : > { %v1098_v30 = vpop.permute.xlu0 %1097 }
 0x2ca   : > { %v1096_v11 = vpop.permute.xlu1 %1095 }
 0x2cb   : > { %v1102_v13 = vsel %vm761_vm11, %v1096_v11, %v1098_v30 }
 0x2cc   : > { %1110 = vst [vmem:[#allocation3 + $0x38] sm:$0x3] %v1102_v13 }
 0x2cd   : > { %v1120_v15 = vpop.permute.xlu0 %1119 }
 0x2ce   : > { %v1178_v21 = vpop.permute.xlu1 %1177 }
 0x2cf   : > { %v2021_v22 = vld [vmem:[#allocation3 + $0x40] sm:$0x3] }
 0x2d0   : > { %1559 = vmatprep.subr.msk.mxu0 %vm1262_vm0, %v2021_v22 }
 0x2d1   : > { %v1142_v17 = vpop.permute.xlu0 %1141 }
 0x2d2   : > { %v1118_v24 = vpop.permute.xlu1 %1117 }
 0x2d3   : > { %v1124_v25 = vsel %vm801_vm12, %v1118_v24, %v1120_v15 }
 0x2d4   : > { %1132 = vst [vmem:[#allocation3 + $0x38] sm:$0xc] %v1124_v25 }
 0x2d5   : > { %v1090_v32 = vpop.permute.xlu0 %1089 }
 0x2d6   : > { %v1140_v27 = vpop.permute.xlu1 %1139 }
 0x2d7   : > { %v1146_v28 = vsel %vm841_vm13, %v1140_v27, %v1142_v17 }
 0x2d8   : > { %1154 = vst [vmem:[#allocation3 + $0x38] sm:$0x30] %v1146_v28 }
 0x2d9   : > { %v1182_v31 = vpop.permute.xlu0 %1181 }
 0x2da   : > { %v1189_v33 = vsel %vm916_vm15, %v1182_v31, %v1184_v8  ;;  %v1180_v20 = vpop.permute.xlu1 %1179 }
 0x2db   : > { %1197 = vst [vmem:[#allocation3 + $0x10] sm:$0x3] %v1189_v33  ;;  %v1187_v34 = vsel %vm916_vm15, %v1178_v21, %v1180_v20  ;;  %v1188_v35 = vsel %vm916_vm15, %v1180_v20, %v1182_v31  ;;  %v1199_v21 = vld [vmem:[%s2122_s3] sm:$0xff]  ;;  %v1200_v20 = vld [vmem:[%s2122_s3 + $0x8] sm:$0xff] }
 0x2dc   : > { %1195 = vst [vmem:[#allocation3 + $0x28] sm:$0x3] %v1187_v34  ;;  %1196 = vst [vmem:[#allocation3 + $0x48] sm:$0x3] %v1188_v35  ;;  %v1620_v31 = vld [vmem:[#allocation2 + $0x20] sm:$0xff] }
 0x2dd   : > { %v1092_v37 = vpop.permute.xlu0 %1091 }
 0x2de   : > { %v1099_v36 = vsel %vm761_vm11, %v1090_v32, %v1092_v37  ;;  %v1094_v38 = vpop.permute.xlu1 %1093 }
 0x2df   : > { %1107 = vst [vmem:[#allocation3 + $0x50] sm:$0x3] %v1099_v36  ;;  %v1100_v39 = vsel %vm761_vm11, %v1092_v37, %v1094_v38  ;;  %v1101_v18 = vsel %vm761_vm11, %v1094_v38, %v1096_v11  ;;  %v1201_v36 = vld [vmem:[%s2122_s3 + $0x10] sm:$0xff]  ;;  %v1202_v38 = vld [vmem:[%s2122_s3 + $0x18] sm:$0xff] }
 0x2e0   : > { %1108 = vst [vmem:[#allocation3 + $0x20] sm:$0x3] %v1100_v39  ;;  %1109 = vst [vmem:[#allocation3 + $0x8] sm:$0x3] %v1101_v18 }
 0x2e1   : > { %v1134_v40 = vpop.permute.xlu0 %1133 }
 0x2e2   : > { %v2033_v23 = vld [vmem:[#allocation3 + $0x10] sm:$0x3]  ;;  %v1112_v41 = vpop.permute.xlu1 %1111 }
 0x2e3   : > { %1560 = vmatpush1.msk.msra.mxu0 %vm1262_vm0, %v2033_v23  ;;  %v1213_v42 = vld [vmem:[#allocation3 + $0x48] sm:$0x3] }
 0x2e4   : > { %v1212_v19 = vld [vmem:[#allocation3 + $0x28] sm:$0x3]  ;;  %1552 = vmatprep.subr.msk.mxu1 %vm1262_vm0, %v1213_v42 }
 0x2e5   : > { %v1014_v45 = vpop.permute.xlu0 %1013  ;;  %1553 = vmatpush1.msk.msra.mxu1 %vm1262_vm0, %v1212_v19 }
 0x2e6   : > { %v1156_v46 = vpop.permute.xlu1 %1155 }
 0x2e9   : > { %v1068_v43 = vpop.permute.xlu0 %1067 }
 0x2ea   : > { %v1041_v47 = vpop.permute.xlu1 %1040 }
 0x2ed   : > { %v1114_v44 = vpop.permute.xlu0 %1113 }
 0x2ee   : > { %v1121_v48 = vsel %vm801_vm12, %v1112_v41, %v1114_v44  ;;  %v1116_v49 = vpop.permute.xlu1 %1115 }
 0x2ef   : > { %1129 = vst [vmem:[#allocation3 + $0x50] sm:$0xc] %v1121_v48  ;;  %v1122_v9 = vsel %vm801_vm12, %v1114_v44, %v1116_v49  ;;  %v1123_v29 = vsel %vm801_vm12, %v1116_v49, %v1118_v24 }
 0x2f0   : > { %1130 = vst [vmem:[#allocation3 + $0x20] sm:$0xc] %v1122_v9  ;;  %1131 = vst [vmem:[#allocation3 + $0x8] sm:$0xc] %v1123_v29 }
 0x2f1   : > { %v1136_v50 = vpop.permute.xlu0 %1135 }
 0x2f2   : > { %v1143_v51 = vsel %vm841_vm13, %v1134_v40, %v1136_v50  ;;  %v1138_v52 = vpop.permute.xlu1 %1137  ;;  %v1203_v40 = vld [vmem:[%s2122_s3 + $0x20] sm:$0x7] }
 0x2f3   : > { %1151 = vst [vmem:[#allocation3 + $0x50] sm:$0x30] %v1143_v51  ;;  %v1144_v53 = vsel %vm841_vm13, %v1136_v50, %v1138_v52  ;;  %v1145_v54 = vsel %vm841_vm13, %v1138_v52, %v1140_v27 }
 0x2f4   : > { %1152 = vst [vmem:[#allocation3 + $0x20] sm:$0x30] %v1144_v53  ;;  %1153 = vst [vmem:[#allocation3 + $0x8] sm:$0x30] %v1145_v54 }
 0x2f5   : > { %v1158_v55 = vpop.permute.xlu0 %1157 }
 0x2f6   : > { %v1165_v56 = vsel %vm881_vm14, %v1156_v46, %v1158_v55  ;;  %v1160_v57 = vpop.permute.xlu1 %1159 }
 0x2f7   : > { %1173 = vst [vmem:[#allocation3 + $0x50] sm:$0xc0] %v1165_v56  ;;  %v1166_v58 = vsel %vm881_vm14, %v1158_v55, %v1160_v57 }
 0x2f8   : > { %1174 = vst [vmem:[#allocation3 + $0x20] sm:$0xc0] %v1166_v58 }
 0x2f9   : > { %v1016_v12 = vpop.permute.xlu0 %1015 }
 0x2fa   : > { %v1023_v59 = vsel %vm646_vm8, %v1014_v45, %v1016_v12  ;;  %v1018_v60 = vpop.permute.xlu1 %1017 }
 0x2fb   : > { %1031 = vst [vmem:[#allocation3 + $0x30] sm:$0xc] %v1023_v59  ;;  %v1024_v61 = vsel %vm646_vm8, %v1016_v12, %v1018_v60 }
 0x2fc   : > { %1032 = vst [vmem:[#allocation3] sm:$0xc] %v1024_v61 }
 0x2fd   : > { %v1043_v62 = vpop.permute.xlu0 %1042 }
 0x2fe   : > { %v1050_v63 = vsel %vm686_vm9, %v1041_v47, %v1043_v62  ;;  %v1045_v14 = vpop.permute.xlu1 %1044  ;;  %v1208_v16 = vld [vmem:[#allocation3 + $0x50] sm:$0xff] }
 0x2ff   : > { %1058 = vst [vmem:[#allocation3 + $0x30] sm:$0x30] %v1050_v63  ;;  %v1051_v0 = vsel %vm686_vm9, %v1043_v62, %v1045_v14  ;;  %v1209_v1 = vld [vmem:[#allocation3 + $0x20] sm:$0xff] }
 0x300   : > { %1059 = vst [vmem:[#allocation3] sm:$0x30] %v1051_v0  ;;  %1303 = vmatprep.subr.mxu1 %v1209_v1 }
 0x301   : > { %v1070_v2 = vpop.permute.xlu0 %1069  ;;  %1304 = vmatpush1.msra.mxu1 %v1208_v16 }
 0x302   : > { %v1077_v3 = vsel %vm726_vm10, %v1068_v43, %v1070_v2  ;;  %v1072_v4 = vpop.permute.xlu1 %1071 }
 0x303   : > { %1085 = vst [vmem:[#allocation3 + $0x30] sm:$0xc0] %v1077_v3  ;;  %v1078_v5 = vsel %vm726_vm10, %v1070_v2, %v1072_v4 }
 0x304   : > { %1086 = vst [vmem:[#allocation3] sm:$0xc0] %v1078_v5 }
 0x305   : > { %v1164_v6 = vpop.permute.xlu0 %1163 }
 0x306   : > { %v1162_v7 = vpop.permute.xlu1 %1161 }
 0x307   : > { %v1167_v26 = vsel %vm881_vm14, %v1160_v57, %v1162_v7  ;;  %v1168_v8 = vsel %vm881_vm14, %v1162_v7, %v1164_v6 }
 0x308   : > { %1175 = vst [vmem:[#allocation3 + $0x8] sm:$0xc0] %v1167_v26  ;;  %1176 = vst [vmem:[#allocation3 + $0x38] sm:$0xc0] %v1168_v8 }
 0x309   : > { %v1022_v10 = vpop.permute.xlu0 %1021 }
 0x30a   : > { %v1020_v30 = vpop.permute.xlu1 %1019  ;;  %v1204_v24 = vld [vmem:[#allocation3 + $0x30] sm:$0xff] }
 0x30b   : > { %v1025_v11 = vsel %vm646_vm8, %v1018_v60, %v1020_v30  ;;  %v1026_v13 = vsel %vm646_vm8, %v1020_v30, %v1022_v10  ;;  %v1205_v15 = vld [vmem:[#allocation3] sm:$0xff] }
 0x30c   : > { %1033 = vst [vmem:[#allocation3 + $0x58] sm:$0xc] %v1025_v11  ;;  %1034 = vst [vmem:[#allocation3 + $0x18] sm:$0xc] %v1026_v13  ;;  %1305 = vmatprep.subr.mxu1 %v1205_v15 }
 0x30d   : > { %v1049_v17 = vpop.permute.xlu0 %1048  ;;  %1306 = vmatpush1.msra.mxu1 %v1204_v24 }
 0x30e   : > { %1554 = vmatmul.mubr.msk.f32.vlgmr.msra.gmra.mxu1 %vm1246_vm1, %v1199_v21  ;;  %1568 = vmatprep.subr.msk.mxu1 %vm1262_vm0, %v2021_v22  ;;  %v1047_v25 = vpop.permute.xlu1 %1046 }
 0x30f   : > { %v1052_v32 = vsel %vm686_vm9, %v1045_v14, %v1047_v25  ;;  %v1053_v27 = vsel %vm686_vm9, %v1047_v25, %v1049_v17  ;;  %1571 = vmatpush1.msk.msra.mxu1 %vm1262_vm0, %v2033_v23  ;;  %v1211_v28 = vld [vmem:[#allocation3 + $0x38] sm:$0xff]  ;;  %1345 = vmatprep.mubr.f32.mxu1 %v1620_v31  ;;  %v1210_v33 = vld [vmem:[#allocation3 + $0x8] sm:$0xff] }
 0x310   : > { %1060 = vst [vmem:[#allocation3 + $0x58] sm:$0x30] %v1052_v32  ;;  %1061 = vst [vmem:[#allocation3 + $0x18] sm:$0x30] %v1053_v27  ;;  %1398 = vmatprep.subr.mxu0 %v1211_v28  ;;  %1569 = vmatprep.subr.mxu1 %v1211_v28 }
 0x311   : > { %v1076_v22 = vpop.permute.xlu0 %1075  ;;  %1399 = vmatpush1.msra.mxu0 %v1210_v33  ;;  %1572 = vmatpush1.msra.mxu1 %v1210_v33 }
 0x312   : > { %1555 = vmatmul.mubr.msk.f32.gmra.mxu1 %vm1246_vm1, %v1200_v20  ;;  %v1074_v34 = vpop.permute.xlu1 %1073 }
 0x313   : > { %v1079_v35 = vsel %vm726_vm10, %v1072_v4, %v1074_v34  ;;  %v1080_v37 = vsel %vm726_vm10, %v1074_v34, %v1076_v22  ;;  %1351 = vmatprep.mubr.f32.mxu1 %v1620_v31 }
 0x314   : > { %1087 = vst [vmem:[#allocation3 + $0x58] sm:$0xc0] %v1079_v35  ;;  %1088 = vst [vmem:[#allocation3 + $0x18] sm:$0xc0] %v1080_v37 }
 0x316   : > { %1556 = vmatmul.mubr.msk.f32.gmra.mxu1 %vm1246_vm1, %v1201_v36 }
 0x317   : > { %1357 = vmatprep.mubr.f32.mxu1 %v1620_v31 }
 0x31a   : > { %1557 = vmatmul.mubr.msk.f32.gmra.mxu1 %vm1246_vm1, %v1202_v38 }
 0x31b   : > { %v1207_v39 = vld [vmem:[#allocation3 + $0x18] sm:$0xff]  ;;  %1363 = vmatprep.mubr.f32.mxu1 %v1620_v31 }
 0x31c   : > { %v1206_v18 = vld [vmem:[#allocation3 + $0x58] sm:$0xff]  ;;  %1400 = vmatprep.subr.mxu0 %v1207_v39  ;;  %1570 = vmatprep.subr.mxu1 %v1207_v39 }
 0x31d   : > { %1401 = vmatpush1.msra.mxu0 %v1206_v18  ;;  %1573 = vmatpush1.msra.mxu1 %v1206_v18 }
 0x31e   : > { %1558 = vmatmul.mubr.msk.f32.gmra.mxu1 %vm1246_vm1, %v1203_v40  ;;  %1561 = vmatmul.mubr.msk.f32.vlgmr.msra.gmra.mxu0 %vm1246_vm1, %v1199_v21  ;;  %v1229_v46 = vpop.permute.xlu0 %1228 }
 0x31f   : > { %1440 = vmatprep.mubr.f32.mxu0 %v1620_v31  ;;  %1452 = vmatprep.mubr.f32.mxu1 %v1620_v31  ;;  %v1224_v23 = vpop.permute.xlu1 %1223 }
 0x322   : > { %1562 = vmatmul.mubr.msk.f32.gmra.mxu0 %vm1246_vm1, %v1200_v20  ;;  %1564 = vmatmul.mubr.msk.f32.vlgmr.msra.gmra.mxu1 %vm1246_vm1, %v1202_v38  ;;  %v1239_v52 = vpop.permute.xlu0 %1238 }
 0x323   : > { %1446 = vmatprep.mubr.f32.mxu0 %v1620_v31  ;;  %1458 = vmatprep.mubr.f32.mxu1 %v1620_v31  ;;  %v1234_v48 = vpop.permute.xlu1 %1233 }
 0x326   : > { %1563 = vmatmul.mubr.msk.f32.gmra.mxu0 %vm1246_vm1, %v1201_v36  ;;  %1565 = vmatmul.mubr.msk.f32.gmra.mxu1 %vm1246_vm1, %v1203_v40 }
 0x327   : > { %v1244_v56 = vpop.permute.xlu1 %1243 }
 0x3ce   : > { %v1341_v41 = vpop.f32.mrf.mxu1 }
 0x3cf   : > { %v1342_v42 = vadd.f32 %v1341_v41, %v1224_v23 }
 0x3d0   : > { %v1343_v19 = vpop.f32.mrf.mxu1 }
 0x3d1   : > { %v1344_v45 = vadd.f32 %v1343_v19, %v1224_v23  ;;  %1465 = vst [vmem:[%s2094_s15] sm:$0xff] %v1342_v42 }
 0x3d2   : > { %v1347_v43 = vpop.f32.mrf.mxu1 }
 0x3d3   : > { %1466 = vst [vmem:[%s2094_s15 + $0x8] sm:$0xff] %v1344_v45  ;;  %v1348_v47 = vadd.f32 %v1347_v43, %v1229_v46 }
 0x3d4   : > { %v1349_v44 = vpop.f32.mrf.mxu1 }
 0x3d5   : > { %1469 = vst [vmem:[%s2094_s15 + $0x20] sm:$0xff] %v1348_v47  ;;  %v1350_v49 = vadd.f32 %v1349_v44, %v1229_v46 }
 0x3d6   : > { %v1353_v9 = vpop.f32.mrf.mxu1 }
 0x3d7   : > { %1470 = vst [vmem:[%s2094_s15 + $0x28] sm:$0xff] %v1350_v49  ;;  %v1354_v29 = vadd.f32 %v1353_v9, %v1234_v48 }
 0x3d8   : > { %v1355_v50 = vpop.f32.mrf.mxu1 }
 0x3d9   : > { %v1356_v51 = vadd.f32 %v1355_v50, %v1234_v48  ;;  %1473 = vst [vmem:[%s2094_s15 + $0x40] sm:$0xff] %v1354_v29 }
 0x3da   : > { %v1359_v53 = vpop.f32.mrf.mxu1 }
 0x3db   : > { %1474 = vst [vmem:[%s2094_s15 + $0x48] sm:$0xff] %v1356_v51  ;;  %v1360_v54 = vadd.f32 %v1359_v53, %v1239_v52 }
 0x3dc   : > { %v1361_v55 = vpop.f32.mrf.mxu1 }
 0x3dd   : > { %1477 = vst [vmem:[%s2094_s15 + $0x60] sm:$0xff] %v1360_v54  ;;  %v1362_v57 = vadd.f32 %v1361_v55, %v1239_v52 }
 0x3de   : > { %v1365_v58 = vpop.f32.mrf.mxu1  ;;  %v1436_v12 = vpop.f32.mrf.mxu0 }
 0x3df   : > { %1478 = vst [vmem:[%s2094_s15 + $0x68] sm:$0xff] %v1362_v57  ;;  %v1437_v59 = vadd.f32 %v1436_v12, %v1224_v23  ;;  %v1366_v60 = vadd.f32 %v1365_v58, %v1244_v56 }
 0x3e0   : > { %v1367_v61 = vpop.f32.mrf.mxu1  ;;  %v1438_v62 = vpop.f32.mrf.mxu0 }
 0x3e1   : > { %1467 = vst [vmem:[%s2094_s15 + $0x10] sm:$0xff] %v1437_v59  ;;  %v1439_v63 = vadd.f32 %v1438_v62, %v1224_v23  ;;  %v1368_v14 = vadd.f32 %v1367_v61, %v1244_v56  ;;  %1481 = vst [vmem:[%s2094_s15 + $0x80] sm:$0x7] %v1366_v60 }
 0x3e2   : > { %v1442_v0 = vpop.f32.mrf.mxu0  ;;  %v1454_v1 = vpop.f32.mrf.mxu1 }
 0x3e3   : > { %1468 = vst [vmem:[%s2094_s15 + $0x18] sm:$0xff] %v1439_v63  ;;  %1482 = vst [vmem:[%s2094_s15 + $0x88] sm:$0x7] %v1368_v14  ;;  %v1443_v2 = vadd.f32 %v1442_v0, %v1229_v46  ;;  %v1455_v16 = vadd.f32 %v1454_v1, %v1239_v52 }
 0x3e4   : > { %v1444_v3 = vpop.f32.mrf.mxu0  ;;  %v1456_v4 = vpop.f32.mrf.mxu1 }
 0x3e5   : > { %1471 = vst [vmem:[%s2094_s15 + $0x30] sm:$0xff] %v1443_v2  ;;  %1479 = vst [vmem:[%s2094_s15 + $0x70] sm:$0xff] %v1455_v16  ;;  %v1445_v5 = vadd.f32 %v1444_v3, %v1229_v46  ;;  %v1457_v6 = vadd.f32 %v1456_v4, %v1239_v52 }
 0x3e6   : > { %v1448_v7 = vpop.f32.mrf.mxu0  ;;  %v1460_v26 = vpop.f32.mrf.mxu1 }
 0x3e7   : > { %1472 = vst [vmem:[%s2094_s15 + $0x38] sm:$0xff] %v1445_v5  ;;  %1480 = vst [vmem:[%s2094_s15 + $0x78] sm:$0xff] %v1457_v6  ;;  %v1449_v8 = vadd.f32 %v1448_v7, %v1234_v48  ;;  %v1461_v10 = vadd.f32 %v1460_v26, %v1244_v56 }
 0x3e8   : > { %v1450_v30 = vpop.f32.mrf.mxu0  ;;  %v1462_v11 = vpop.f32.mrf.mxu1 }
 0x3e9   : > { %1475 = vst [vmem:[%s2094_s15 + $0x50] sm:$0xff] %v1449_v8  ;;  %1483 = vst [vmem:[%s2094_s15 + $0x90] sm:$0x7] %v1461_v10  ;;  %v1451_v13 = vadd.f32 %v1450_v30, %v1234_v48  ;;  %v1463_v15 = vadd.f32 %v1462_v11, %v1244_v56 }
 0x3eb   : > { %1476 = vst [vmem:[%s2094_s15 + $0x58] sm:$0xff] %v1451_v13  ;;  %1484 = vst [vmem:[%s2094_s15 + $0x98] sm:$0x7] %v1463_v15 }
 0x3ec PF: > { %s16_s21 = sadd.s32 1, %s1627_s21  }
 0x3ed   : > { %p13_p4 = scmp.ge.s32.totalorder %s16_s21, 4  }
 0x3ef   :  { %15 = sbr.rel (!%p13_p4) target bundleno = 1 (0x1), region = 74 }

</bundles_post_ra>
